<compile_context>
chip_gen: v7x
topology: tpu7x:2x2x1
jax: 0.10.0
libtpu: 0.0.40
codegen_flags: <defaults>
</compile_context>

<pallas_src>
import functools
import math

import jax
import jax.numpy as jnp
from jax.experimental import pallas as pl
from jax.experimental.pallas import tpu as pltpu
from jax.scipy.special import erf as _erf_exact

LN_EPS = 1e-6            # partial(nn.LayerNorm, eps=1e-06)
_INV_SQRT2 = 0.7071067811865476


# ----------------------------- in-kernel math -------------------------------

def _erf_poly(x):
    # Abramowitz & Stegun 7.1.26, |err| <= 1.5e-7 (float32-exact for our use).
    a1, a2, a3, a4, a5 = 0.254829592, -0.284496736, 1.421413741, -1.453152027, 1.061405429
    pc = 0.3275911
    ax = jnp.abs(x)
    t = pl.reciprocal(1.0 + pc * ax, approx=True)       # EUP, not VALU
    poly = ((((a5 * t + a4) * t + a3) * t + a2) * t + a1) * t
    y = 1.0 - poly * jnp.exp(-ax * ax)
    return jnp.where(x >= 0.0, y, -y)


def _gelu_exact(x):
    # PyTorch nn.GELU() default (erf-based).
    return 0.5 * x * (1.0 + _erf_poly(x * _INV_SQRT2))


def _layernorm(x, g, b):
    mu = jnp.mean(x, axis=-1, keepdims=True)
    var = jnp.mean(jnp.square(x - mu), axis=-1, keepdims=True)
    return (x - mu) * jax.lax.rsqrt(var + LN_EPS) * g + b


# ------------------------------- fused kernel --------------------------------

def _fused_encoder_kernel(x_ref, pos_ref,
                          ln1_g, ln1_b, wqkv, bqkv, wo, bo,
                          ln2_g, ln2_b, w1, b1, w2, b2,
                          lnf_g, lnf_b,
                          o_ref, acc_ref, *, num_heads, compute_dtype):
    """Grid = (batch, layer).  acc_ref keeps the activation resident in VMEM
    across the layer sweep; weight refs hold the current layer's slice."""
    layer = pl.program_id(1)
    cdt = compute_dtype

    @pl.when(layer == 0)
    def _():
        # pos-embedding add (+ eval-mode dropout = identity)
        acc_ref[...] = x_ref[0].astype(jnp.float32) + pos_ref[0].astype(jnp.float32)

    x = acc_ref[...]                     # (S, D) float32
    S, D = x.shape
    hd = D // num_heads
    scale = 1.0 / float(hd) ** 0.5

    # ---- self-attention branch: x + MHA(LN1(x)) ----
    xn = _layernorm(x, ln1_g[0], ln1_b[0])
    qkv = jnp.dot(xn.astype(cdt), wqkv[0],
                  preferred_element_type=jnp.float32) + bqkv[0]       # (S, 3D) f32
    q = qkv[:, :D].reshape(S, num_heads, hd).astype(cdt)
    k = qkv[:, D:2 * D].reshape(S, num_heads, hd).astype(cdt)
    v = qkv[:, 2 * D:].reshape(S, num_heads, hd).astype(cdt)

    s = jnp.einsum('qhd,khd->hqk', q, k,
                   preferred_element_type=jnp.float32) * scale        # (H, S, S)
    s = s - jnp.max(s, axis=-1, keepdims=True)
    p = jnp.exp(s)
    p = p * pl.reciprocal(jnp.sum(p, axis=-1, keepdims=True), approx=True)
    attn = jnp.einsum('hqk,khd->qhd', p.astype(cdt), v,
                      preferred_element_type=jnp.float32).reshape(S, D)
    attn = jnp.dot(attn.astype(cdt), wo[0],
                   preferred_element_type=jnp.float32) + bo[0]
    x1 = x + attn                        # dropout = identity (eval)

    # ---- MLP branch: x1 + MLP(LN2(x1)) ----
    y = _layernorm(x1, ln2_g[0], ln2_b[0])
    h1 = jnp.dot(y.astype(cdt), w1[0],
                 preferred_element_type=jnp.float32) + b1[0]
    h1 = _gelu_exact(h1)
    h2 = jnp.dot(h1.astype(cdt), w2[0],
                 preferred_element_type=jnp.float32) + b2[0]
    acc_ref[...] = x1 + h2

    # ---- fused final LayerNorm, written once per batch element ----
    @pl.when(layer == pl.num_programs(1) - 1)
    def _():
        o_ref[0] = _layernorm(acc_ref[...], lnf_g[...], lnf_b[...]).astype(o_ref.dtype)


# ------------------------------ wrapper ---------------------------------------

_STACKED = ('ln1_g', 'ln1_b', 'w_qkv', 'b_qkv', 'w_o', 'b_o',
            'ln2_g', 'ln2_b', 'w_1', 'b_1', 'w_2', 'b_2')
_MXU_WEIGHTS = frozenset({'w_qkv', 'w_o', 'w_1', 'w_2'})


def encoder_forward(x, pos, stacked, ln_g, ln_b, num_heads,
                    compute_dtype=jnp.bfloat16):
    B, S, D = x.shape
    L = stacked['w_qkv'].shape[0]

    weights, w_specs = [], []
    for name in _STACKED:
        w = stacked[name]
        if name in _MXU_WEIGHTS:
            w = w.astype(compute_dtype)          # halve weight DMA bytes, MXU bf16
        weights.append(w)
        w_specs.append(pl.BlockSpec((1,) + w.shape[1:], lambda b, l: (l, 0, 0)))

    in_specs = ([pl.BlockSpec((1, S, D), lambda b, l: (b, 0, 0)),   # x
                 pl.BlockSpec((1, S, D), lambda b, l: (0, 0, 0))]   # pos
                + w_specs
                + [pl.BlockSpec(ln_g.shape, lambda b, l: (0, 0)),   # final LN
                   pl.BlockSpec(ln_b.shape, lambda b, l: (0, 0))])

    # Explicit VMEM budget: double-buffered per-layer weight slices +
    # activation blocks + f32 scratch, with 2x headroom (capped for v7x 64 MiB).
    weight_block_bytes = sum(math.prod(w.shape[1:]) * w.dtype.itemsize for w in weights)
    needed = 2 * weight_block_bytes + 2 * 3 * S * D * x.dtype.itemsize + S * D * 4
    vmem_limit = int(min(64 * 1024 * 1024, max(2 * needed, 16 * 1024 * 1024)))

    return pl.pallas_call(
        functools.partial(_fused_encoder_kernel, num_heads=num_heads,
                          compute_dtype=compute_dtype),
        out_shape=jax.ShapeDtypeStruct((B, S, D), x.dtype),
        grid=(B, L),
        in_specs=in_specs,
        out_specs=pl.BlockSpec((1, S, D), lambda b, l: (b, 0, 0)),
        scratch_shapes=[pltpu.VMEM((S, D), jnp.float32)],
        compiler_params=pltpu.CompilerParams(
            dimension_semantics=("parallel", "arbitrary"),
            vmem_limit_bytes=vmem_limit),
    )(x, pos, *weights, ln_g, ln_b)


# --------------------------- parameter init -----------------------------------

def init_params(key, num_layers, hidden_dim, mlp_dim, seq_length):
    D, M, L = hidden_dim, mlp_dim, num_layers
    k = jax.random.split(key, 9)
    std = 0.02
    pos = std * jax.random.normal(k[0], (1, seq_length, D), jnp.float32)
    stacked = dict(
        ln1_g=jnp.ones((L, 1, D), jnp.float32),
        ln1_b=jnp.zeros((L, 1, D), jnp.float32),
        w_qkv=std * jax.random.normal(k[1], (L, D, 3 * D), jnp.float32),
        b_qkv=std * jax.random.normal(k[2], (L, 1, 3 * D), jnp.float32),
        w_o=std * jax.random.normal(k[3], (L, D, D), jnp.float32),
        b_o=std * jax.random.normal(k[4], (L, 1, D), jnp.float32),
        ln2_g=jnp.ones((L, 1, D), jnp.float32),
        ln2_b=jnp.zeros((L, 1, D), jnp.float32),
        w_1=std * jax.random.normal(k[5], (L, D, M), jnp.float32),
        b_1=std * jax.random.normal(k[6], (L, 1, M), jnp.float32),
        w_2=std * jax.random.normal(k[7], (L, M, D), jnp.float32),
        b_2=std * jax.random.normal(k[8], (L, 1, D), jnp.float32),
    )
    return pos, stacked, jnp.ones((1, D), jnp.float32), jnp.zeros((1, D), jnp.float32)


# ---------------------------- pure-JAX reference -------------------------------
# Mirrors the kernel's bf16-operand / f32-accumulation matmul policy so the
# comparison isolates kernel correctness (exact erf + exact softmax division).

def _ref_ln(x, g, b):
    mu = x.mean(-1, keepdims=True)
    var = ((x - mu) ** 2).mean(-1, keepdims=True)
    return (x - mu) / jnp.sqrt(var + LN_EPS) * g + b


def encoder_ref(x, pos, stacked, ln_g, ln_b, num_heads, compute_dtype=jnp.bfloat16):
    B, S, D = x.shape
    L = stacked['w_qkv'].shape[0]
    H, hd = num_heads, D // num_heads
    cdt = compute_dtype
    scale = 1.0 / float(hd) ** 0.5

    def mm(a, w):
        return jnp.dot(a.astype(cdt), w.astype(cdt), preferred_element_type=jnp.float32)

    h = x + pos
    for i in range(L):
        p = {name: v[i] for name, v in stacked.items()}
        xn = _ref_ln(h, p['ln1_g'], p['ln1_b'])
        qkv = mm(xn, p['w_qkv']) + p['b_qkv']
        q, k_, v_ = jnp.split(qkv, 3, axis=-1)
        q = q.reshape(B, S, H, hd).astype(cdt)
        k_ = k_.reshape(B, S, H, hd).astype(cdt)
        v_ = v_.reshape(B, S, H, hd).astype(cdt)
        s = jnp.einsum('bqhd,bkhd->bhqk', q, k_,
                       preferred_element_type=jnp.float32) * scale
        a = jax.nn.softmax(s, axis=-1)
        o = jnp.einsum('bhqk,bkhd->bqhd', a.astype(cdt), v_,
                       preferred_element_type=jnp.float32).reshape(B, S, D)
        o = mm(o, p['w_o']) + p['b_o']
        h1 = h + o
        y = _ref_ln(h1, p['ln2_g'], p['ln2_b'])
        m = mm(y, p['w_1']) + p['b_1']
        m = 0.5 * m * (1.0 + _erf_exact(m * _INV_SQRT2))     # exact GELU
        m = mm(m, p['w_2']) + p['b_2']
        h = h1 + m
    return _ref_ln(h, ln_g, ln_b)


# ----------------------------------- main --------------------------------------

if __name__ == "__main__":
    # small ViT-encoder config: seq=8, layers=2, heads=4, hidden=32, mlp=64,
    # dropout=0 (eval), batch=2
    B, S, D, H, M, L = 2, 8, 32, 4, 64, 2

    key = jax.random.PRNGKey(0)
    kx, kp = jax.random.split(key)
    x = jax.random.normal(kx, (B, S, D), jnp.float32)
    pos, stacked, ln_g, ln_b = init_params(kp, L, D, M, S)

    out = encoder_forward(x, pos, stacked, ln_g, ln_b, H)
    out = jax.block_until_ready(out)

    ref = encoder_ref(x, pos, stacked, ln_g, ln_b, H)
    if not bool(jnp.allclose(out, ref, atol=2e-3, rtol=2e-3)):
        err = float(jnp.max(jnp.abs(out - ref)))
        raise SystemExit(f"mismatch vs pure-JAX reference (max abs err = {err})")

    print("KERNEL_OK")
</pallas_src>

<mosaic_0001>
module attributes {stable_mosaic.version = 11 : i64} {
  func.func @_fused_encoder_kernel(%arg0: i32, %arg1: i32, %arg2: memref<1x8x32xf32, #tpu.memory_space<vmem>>, %arg3: memref<1x8x32xf32, #tpu.memory_space<vmem>>, %arg4: memref<1x1x32xf32, #tpu.memory_space<vmem>>, %arg5: memref<1x1x32xf32, #tpu.memory_space<vmem>>, %arg6: memref<1x32x96xbf16, #tpu.memory_space<vmem>>, %arg7: memref<1x1x96xf32, #tpu.memory_space<vmem>>, %arg8: memref<1x32x32xbf16, #tpu.memory_space<vmem>>, %arg9: memref<1x1x32xf32, #tpu.memory_space<vmem>>, %arg10: memref<1x1x32xf32, #tpu.memory_space<vmem>>, %arg11: memref<1x1x32xf32, #tpu.memory_space<vmem>>, %arg12: memref<1x32x64xbf16, #tpu.memory_space<vmem>>, %arg13: memref<1x1x64xf32, #tpu.memory_space<vmem>>, %arg14: memref<1x64x32xbf16, #tpu.memory_space<vmem>>, %arg15: memref<1x1x32xf32, #tpu.memory_space<vmem>>, %arg16: memref<1x32xf32, #tpu.memory_space<vmem>>, %arg17: memref<1x32xf32, #tpu.memory_space<vmem>>, %arg18: memref<1x8x32xf32, #tpu.memory_space<vmem>>, %arg19: memref<8x32xf32, #tpu.memory_space<vmem>>) attributes {dimension_semantics = [#tpu.dimension_semantics<parallel>, #tpu.dimension_semantics<arbitrary>], iteration_bounds = array<i64: 2, 2>, scalar_prefetch = 0 : i64, scratch_operands = 1 : i64, tpu.core_type = #tpu.core_type<tc>, window_params = [{transform_indices = @transform_0, window_bounds = array<i64: 1, 8, 32>}, {pipeline_mode = #tpu.pipeline_mode<synchronous>, transform_indices = @transform_1, window_bounds = array<i64: 1, 8, 32>}, {transform_indices = @transform_2, window_bounds = array<i64: 1, 1, 32>}, {transform_indices = @transform_3, window_bounds = array<i64: 1, 1, 32>}, {transform_indices = @transform_4, window_bounds = array<i64: 1, 32, 96>}, {transform_indices = @transform_5, window_bounds = array<i64: 1, 1, 96>}, {transform_indices = @transform_6, window_bounds = array<i64: 1, 32, 32>}, {transform_indices = @transform_7, window_bounds = array<i64: 1, 1, 32>}, {transform_indices = @transform_8, window_bounds = array<i64: 1, 1, 32>}, {transform_indices = @transform_9, window_bounds = array<i64: 1, 1, 32>}, {transform_indices = @transform_10, window_bounds = array<i64: 1, 32, 64>}, {transform_indices = @transform_11, window_bounds = array<i64: 1, 1, 64>}, {transform_indices = @transform_12, window_bounds = array<i64: 1, 64, 32>}, {transform_indices = @transform_13, window_bounds = array<i64: 1, 1, 32>}, {pipeline_mode = #tpu.pipeline_mode<synchronous>, transform_indices = @transform_14, window_bounds = array<i64: 1, 32>}, {pipeline_mode = #tpu.pipeline_mode<synchronous>, transform_indices = @transform_15, window_bounds = array<i64: 1, 32>}, {transform_indices = @transform_16, window_bounds = array<i64: 1, 8, 32>}]} {
    %c0_i32 = arith.constant 0 : i32
    %0 = arith.cmpi eq, %arg1, %c0_i32 : i32
    %1 = arith.extui %0 : i1 to i32
    %c0_i32_0 = arith.constant 0 : i32
    %2 = arith.cmpi ne, %1, %c0_i32_0 : i32
    scf.if %2 {
      %c0_73 = arith.constant 0 : index
      %c0_74 = arith.constant 0 : index
      %c0_75 = arith.constant 0 : index
      %159 = vector.load %arg2[%c0_73, %c0_74, %c0_75] : memref<1x8x32xf32, #tpu.memory_space<vmem>>, vector<1x8x32xf32>
      %160 = vector.shape_cast %159 : vector<1x8x32xf32> to vector<8x32xf32>
      %c0_76 = arith.constant 0 : index
      %c0_77 = arith.constant 0 : index
      %c0_78 = arith.constant 0 : index
      %161 = vector.load %arg3[%c0_76, %c0_77, %c0_78] : memref<1x8x32xf32, #tpu.memory_space<vmem>>, vector<1x8x32xf32>
      %162 = vector.shape_cast %161 : vector<1x8x32xf32> to vector<8x32xf32>
      %163 = arith.addf %160, %162 : vector<8x32xf32>
      %c0_79 = arith.constant 0 : index
      %c0_80 = arith.constant 0 : index
      %164 = vector.load %arg19[%c0_79, %c0_80] : memref<8x32xf32, #tpu.memory_space<vmem>>, vector<8x32xf32>
      tpu.vector_store %arg19[%c0_79, %c0_80], %163 {strides = array<i32>} : memref<8x32xf32, #tpu.memory_space<vmem>>, vector<8x32xf32>,
    } else {
    }
    %c0 = arith.constant 0 : index
    %c0_1 = arith.constant 0 : index
    %3 = vector.load %arg19[%c0, %c0_1] : memref<8x32xf32, #tpu.memory_space<vmem>>, vector<8x32xf32>
    %c0_2 = arith.constant 0 : index
    %c0_3 = arith.constant 0 : index
    %c0_4 = arith.constant 0 : index
    %4 = vector.load %arg4[%c0_2, %c0_3, %c0_4] : memref<1x1x32xf32, #tpu.memory_space<vmem>>, vector<1x1x32xf32>
    %5 = vector.shape_cast %4 : vector<1x1x32xf32> to vector<1x32xf32>
    %c0_5 = arith.constant 0 : index
    %c0_6 = arith.constant 0 : index
    %c0_7 = arith.constant 0 : index
    %6 = vector.load %arg5[%c0_5, %c0_6, %c0_7] : memref<1x1x32xf32, #tpu.memory_space<vmem>>, vector<1x1x32xf32>
    %7 = vector.shape_cast %6 : vector<1x1x32xf32> to vector<1x32xf32>
    %cst = arith.constant dense<0.000000e+00> : vector<8xf32>
    %8 = vector.multi_reduction <add>, %3, %cst [1] : vector<8x32xf32> to vector<8xf32>
    %9 = vector.shape_cast %8 : vector<8xf32> to vector<8x1xf32>
    %cst_8 = arith.constant 3.200000e+01 : f32
    %10 = vector.broadcast %cst_8 : f32 to vector<8x1xf32>
    %11 = arith.divf %9, %10 : vector<8x1xf32>
    %12 = vector.broadcast %11 : vector<8x1xf32> to vector<8x32xf32>
    %13 = arith.subf %3, %12 : vector<8x32xf32>
    %14 = arith.mulf %13, %13 : vector<8x32xf32>
    %cst_9 = arith.constant dense<0.000000e+00> : vector<8xf32>
    %15 = vector.multi_reduction <add>, %14, %cst_9 [1] : vector<8x32xf32> to vector<8xf32>
    %16 = vector.shape_cast %15 : vector<8xf32> to vector<8x1xf32>
    %cst_10 = arith.constant 3.200000e+01 : f32
    %17 = vector.broadcast %cst_10 : f32 to vector<8x1xf32>
    %18 = arith.divf %16, %17 : vector<8x1xf32>
    %19 = vector.broadcast %11 : vector<8x1xf32> to vector<8x32xf32>
    %20 = arith.subf %3, %19 : vector<8x32xf32>
    %cst_11 = arith.constant 9.99999997E-7 : f32
    %21 = vector.broadcast %cst_11 : f32 to vector<8x1xf32>
    %22 = arith.addf %18, %21 : vector<8x1xf32>
    %23 = math.rsqrt %22 : vector<8x1xf32>
    %24 = vector.broadcast %23 : vector<8x1xf32> to vector<8x32xf32>
    %25 = arith.mulf %20, %24 : vector<8x32xf32>
    %26 = vector.broadcast %5 : vector<1x32xf32> to vector<8x32xf32>
    %27 = arith.mulf %25, %26 : vector<8x32xf32>
    %28 = vector.broadcast %7 : vector<1x32xf32> to vector<8x32xf32>
    %29 = arith.addf %27, %28 : vector<8x32xf32>
    %30 = arith.truncf %29 : vector<8x32xf32> to vector<8x32xbf16>
    %c0_12 = arith.constant 0 : index
    %c0_13 = arith.constant 0 : index
    %c0_14 = arith.constant 0 : index
    %31 = vector.load %arg6[%c0_12, %c0_13, %c0_14] : memref<1x32x96xbf16, #tpu.memory_space<vmem>>, vector<1x32x96xbf16>
    %32 = vector.shape_cast %31 : vector<1x32x96xbf16> to vector<32x96xbf16>
    %cst_15 = arith.constant dense<0.000000e+00> : vector<8x96xf32>
    %33 = tpu.matmul %30, %32, %cst_15 {dimension_numbers = #tpu.dot_dimension_numbers<[1], [0], [0], [1], [0, 0, 1, 1], [], []>} : vector<8x32xbf16>, vector<32x96xbf16>, vector<8x96xf32> -> vector<8x96xf32>
    %c0_16 = arith.constant 0 : index
    %c0_17 = arith.constant 0 : index
    %c0_18 = arith.constant 0 : index
    %34 = vector.load %arg7[%c0_16, %c0_17, %c0_18] : memref<1x1x96xf32, #tpu.memory_space<vmem>>, vector<1x1x96xf32>
    %35 = vector.shape_cast %34 : vector<1x1x96xf32> to vector<1x96xf32>
    %36 = vector.broadcast %35 : vector<1x96xf32> to vector<8x96xf32>
    %37 = arith.addf %33, %36 : vector<8x96xf32>
    %38 = vector.extract_strided_slice %37 {offsets = [0, 0], sizes = [8, 32], strides = [1, 1]} : vector<8x96xf32> to vector<8x32xf32>
    %39 = vector.shape_cast %38 : vector<8x32xf32> to vector<8x4x8xf32>
    %40 = arith.truncf %39 : vector<8x4x8xf32> to vector<8x4x8xbf16>
    %41 = vector.extract_strided_slice %37 {offsets = [0, 32], sizes = [8, 32], strides = [1, 1]} : vector<8x96xf32> to vector<8x32xf32>
    %42 = vector.shape_cast %41 : vector<8x32xf32> to vector<8x4x8xf32>
    %43 = arith.truncf %42 : vector<8x4x8xf32> to vector<8x4x8xbf16>
    %44 = vector.extract_strided_slice %37 {offsets = [0, 64], sizes = [8, 32], strides = [1, 1]} : vector<8x96xf32> to vector<8x32xf32>
    %45 = vector.shape_cast %44 : vector<8x32xf32> to vector<8x4x8xf32>
    %46 = arith.truncf %45 : vector<8x4x8xf32> to vector<8x4x8xbf16>
    "tpu.trace_start"() <{level = 10 : i32, message = "qhd,khd->hqk"}> : () -> ()
    %cst_19 = arith.constant dense<0.000000e+00> : vector<4x8x8xf32>
    %47 = tpu.matmul %40, %43, %cst_19 {dimension_numbers = #tpu.dot_dimension_numbers<[2], [2], [0], [0], [0, 1, 0, 0, 1, 0], [1], [1]>} : vector<8x4x8xbf16>, vector<8x4x8xbf16>, vector<4x8x8xf32> -> vector<4x8x8xf32>
    "tpu.trace_stop"() : () -> ()
    %cst_20 = arith.constant 0.353553385 : f32
    %48 = vector.broadcast %cst_20 : f32 to vector<4x8x8xf32>
    %49 = arith.mulf %47, %48 : vector<4x8x8xf32>
    %cst_21 = arith.constant dense<0xFF800000> : vector<4x8xf32>
    %50 = vector.multi_reduction <maximumf>, %49, %cst_21 [2] : vector<4x8x8xf32> to vector<4x8xf32>
    %51 = vector.shape_cast %50 : vector<4x8xf32> to vector<4x8x1xf32>
    %52 = vector.broadcast %51 : vector<4x8x1xf32> to vector<4x8x8xf32>
    %53 = arith.subf %49, %52 : vector<4x8x8xf32>
    %54 = math.exp %53 : vector<4x8x8xf32>
    %cst_22 = arith.constant dense<0.000000e+00> : vector<4x8xf32>
    %55 = vector.multi_reduction <add>, %54, %cst_22 [2] : vector<4x8x8xf32> to vector<4x8xf32>
    %56 = vector.shape_cast %55 : vector<4x8xf32> to vector<4x8x1xf32>
    %57 = tpu.reciprocal %56 {approx = true} : vector<4x8x1xf32> -> vector<4x8x1xf32>
    %58 = vector.broadcast %57 : vector<4x8x1xf32> to vector<4x8x8xf32>
    %59 = arith.mulf %54, %58 : vector<4x8x8xf32>
    %60 = arith.truncf %59 : vector<4x8x8xf32> to vector<4x8x8xbf16>
    "tpu.trace_start"() <{level = 10 : i32, message = "hqk,khd->qhd"}> : () -> ()
    %cst_23 = arith.constant dense<0.000000e+00> : vector<4x8x8xf32>
    %61 = tpu.matmul %46, %60, %cst_23 {dimension_numbers = #tpu.dot_dimension_numbers<[0], [2], [2], [1], [0, 1, 0, 2, 1, 1], [1], [0]>} : vector<8x4x8xbf16>, vector<4x8x8xbf16>, vector<4x8x8xf32> -> vector<4x8x8xf32>
    %62 = tpu.transpose %61, [2, 0, 1] : vector<4x8x8xf32> -> vector<8x4x8xf32>
    "tpu.trace_stop"() : () -> ()
    %63 = vector.shape_cast %62 : vector<8x4x8xf32> to vector<8x32xf32>
    %64 = arith.truncf %63 : vector<8x32xf32> to vector<8x32xbf16>
    %c0_24 = arith.constant 0 : index
    %c0_25 = arith.constant 0 : index
    %c0_26 = arith.constant 0 : index
    %65 = vector.load %arg8[%c0_24, %c0_25, %c0_26] : memref<1x32x32xbf16, #tpu.memory_space<vmem>>, vector<1x32x32xbf16>
    %66 = vector.shape_cast %65 : vector<1x32x32xbf16> to vector<32x32xbf16>
    %cst_27 = arith.constant dense<0.000000e+00> : vector<8x32xf32>
    %67 = tpu.matmul %64, %66, %cst_27 {dimension_numbers = #tpu.dot_dimension_numbers<[1], [0], [0], [1], [0, 0, 1, 1], [], []>} : vector<8x32xbf16>, vector<32x32xbf16>, vector<8x32xf32> -> vector<8x32xf32>
    %c0_28 = arith.constant 0 : index
    %c0_29 = arith.constant 0 : index
    %c0_30 = arith.constant 0 : index
    %68 = vector.load %arg9[%c0_28, %c0_29, %c0_30] : memref<1x1x32xf32, #tpu.memory_space<vmem>>, vector<1x1x32xf32>
    %69 = vector.shape_cast %68 : vector<1x1x32xf32> to vector<1x32xf32>
    %70 = vector.broadcast %69 : vector<1x32xf32> to vector<8x32xf32>
    %71 = arith.addf %67, %70 : vector<8x32xf32>
    %72 = arith.addf %3, %71 : vector<8x32xf32>
    %c0_31 = arith.constant 0 : index
    %c0_32 = arith.constant 0 : index
    %c0_33 = arith.constant 0 : index
    %73 = vector.load %arg10[%c0_31, %c0_32, %c0_33] : memref<1x1x32xf32, #tpu.memory_space<vmem>>, vector<1x1x32xf32>
    %74 = vector.shape_cast %73 : vector<1x1x32xf32> to vector<1x32xf32>
    %c0_34 = arith.constant 0 : index
    %c0_35 = arith.constant 0 : index
    %c0_36 = arith.constant 0 : index
    %75 = vector.load %arg11[%c0_34, %c0_35, %c0_36] : memref<1x1x32xf32, #tpu.memory_space<vmem>>, vector<1x1x32xf32>
    %76 = vector.shape_cast %75 : vector<1x1x32xf32> to vector<1x32xf32>
    %cst_37 = arith.constant dense<0.000000e+00> : vector<8xf32>
    %77 = vector.multi_reduction <add>, %72, %cst_37 [1] : vector<8x32xf32> to vector<8xf32>
    %78 = vector.shape_cast %77 : vector<8xf32> to vector<8x1xf32>
    %cst_38 = arith.constant 3.200000e+01 : f32
    %79 = vector.broadcast %cst_38 : f32 to vector<8x1xf32>
    %80 = arith.divf %78, %79 : vector<8x1xf32>
    %81 = vector.broadcast %80 : vector<8x1xf32> to vector<8x32xf32>
    %82 = arith.subf %72, %81 : vector<8x32xf32>
    %83 = arith.mulf %82, %82 : vector<8x32xf32>
    %cst_39 = arith.constant dense<0.000000e+00> : vector<8xf32>
    %84 = vector.multi_reduction <add>, %83, %cst_39 [1] : vector<8x32xf32> to vector<8xf32>
    %85 = vector.shape_cast %84 : vector<8xf32> to vector<8x1xf32>
    %cst_40 = arith.constant 3.200000e+01 : f32
    %86 = vector.broadcast %cst_40 : f32 to vector<8x1xf32>
    %87 = arith.divf %85, %86 : vector<8x1xf32>
    %88 = vector.broadcast %80 : vector<8x1xf32> to vector<8x32xf32>
    %89 = arith.subf %72, %88 : vector<8x32xf32>
    %cst_41 = arith.constant 9.99999997E-7 : f32
    %90 = vector.broadcast %cst_41 : f32 to vector<8x1xf32>
    %91 = arith.addf %87, %90 : vector<8x1xf32>
    %92 = math.rsqrt %91 : vector<8x1xf32>
    %93 = vector.broadcast %92 : vector<8x1xf32> to vector<8x32xf32>
    %94 = arith.mulf %89, %93 : vector<8x32xf32>
    %95 = vector.broadcast %74 : vector<1x32xf32> to vector<8x32xf32>
    %96 = arith.mulf %94, %95 : vector<8x32xf32>
    %97 = vector.broadcast %76 : vector<1x32xf32> to vector<8x32xf32>
    %98 = arith.addf %96, %97 : vector<8x32xf32>
    %99 = arith.truncf %98 : vector<8x32xf32> to vector<8x32xbf16>
    %c0_42 = arith.constant 0 : index
    %c0_43 = arith.constant 0 : index
    %c0_44 = arith.constant 0 : index
    %100 = vector.load %arg12[%c0_42, %c0_43, %c0_44] : memref<1x32x64xbf16, #tpu.memory_space<vmem>>, vector<1x32x64xbf16>
    %101 = vector.shape_cast %100 : vector<1x32x64xbf16> to vector<32x64xbf16>
    %cst_45 = arith.constant dense<0.000000e+00> : vector<8x64xf32>
    %102 = tpu.matmul %99, %101, %cst_45 {dimension_numbers = #tpu.dot_dimension_numbers<[1], [0], [0], [1], [0, 0, 1, 1], [], []>} : vector<8x32xbf16>, vector<32x64xbf16>, vector<8x64xf32> -> vector<8x64xf32>
    %c0_46 = arith.constant 0 : index
    %c0_47 = arith.constant 0 : index
    %c0_48 = arith.constant 0 : index
    %103 = vector.load %arg13[%c0_46, %c0_47, %c0_48] : memref<1x1x64xf32, #tpu.memory_space<vmem>>, vector<1x1x64xf32>
    %104 = vector.shape_cast %103 : vector<1x1x64xf32> to vector<1x64xf32>
    %105 = vector.broadcast %104 : vector<1x64xf32> to vector<8x64xf32>
    %106 = arith.addf %102, %105 : vector<8x64xf32>
    %cst_49 = arith.constant 5.000000e-01 : f32
    %107 = vector.broadcast %cst_49 : f32 to vector<8x64xf32>
    %108 = arith.mulf %107, %106 : vector<8x64xf32>
    %cst_50 = arith.constant 0.707106769 : f32
    %109 = vector.broadcast %cst_50 : f32 to vector<8x64xf32>
    %110 = arith.mulf %106, %109 : vector<8x64xf32>
    %111 = math.absf %110 : vector<8x64xf32>
    %cst_51 = arith.constant 0.327591091 : f32
    %112 = vector.broadcast %cst_51 : f32 to vector<8x64xf32>
    %113 = arith.mulf %112, %111 : vector<8x64xf32>
    %cst_52 = arith.constant 1.000000e+00 : f32
    %114 = vector.broadcast %cst_52 : f32 to vector<8x64xf32>
    %115 = arith.addf %114, %113 : vector<8x64xf32>
    %116 = tpu.reciprocal %115 {approx = true} : vector<8x64xf32> -> vector<8x64xf32>
    %cst_53 = arith.constant 1.06140542 : f32
    %117 = vector.broadcast %cst_53 : f32 to vector<8x64xf32>
    %118 = arith.mulf %117, %116 : vector<8x64xf32>
    %cst_54 = arith.constant -1.45315206 : f32
    %119 = vector.broadcast %cst_54 : f32 to vector<8x64xf32>
    %120 = arith.addf %118, %119 : vector<8x64xf32>
    %121 = arith.mulf %120, %116 : vector<8x64xf32>
    %cst_55 = arith.constant 1.42141378 : f32
    %122 = vector.broadcast %cst_55 : f32 to vector<8x64xf32>
    %123 = arith.addf %121, %122 : vector<8x64xf32>
    %124 = arith.mulf %123, %116 : vector<8x64xf32>
    %cst_56 = arith.constant -0.284496725 : f32
    %125 = vector.broadcast %cst_56 : f32 to vector<8x64xf32>
    %126 = arith.addf %124, %125 : vector<8x64xf32>
    %127 = arith.mulf %126, %116 : vector<8x64xf32>
    %cst_57 = arith.constant 0.254829586 : f32
    %128 = vector.broadcast %cst_57 : f32 to vector<8x64xf32>
    %129 = arith.addf %127, %128 : vector<8x64xf32>
    %130 = arith.mulf %129, %116 : vector<8x64xf32>
    %cst_58 = arith.constant 0.000000e+00 : f32
    %131 = vector.broadcast %cst_58 : f32 to vector<8x64xf32>
    %132 = arith.subf %131, %111 : vector<8x64xf32>
    %133 = arith.mulf %132, %111 : vector<8x64xf32>
    %134 = math.exp %133 : vector<8x64xf32>
    %135 = arith.mulf %130, %134 : vector<8x64xf32>
    %cst_59 = arith.constant 1.000000e+00 : f32
    %136 = vector.broadcast %cst_59 : f32 to vector<8x64xf32>
    %137 = arith.subf %136, %135 : vector<8x64xf32>
    %cst_60 = arith.constant 0.000000e+00 : f32
    %138 = vector.broadcast %cst_60 : f32 to vector<8x64xf32>
    %139 = arith.cmpf oge, %110, %138 : vector<8x64xf32>
    %cst_61 = arith.constant 0.000000e+00 : f32
    %140 = vector.broadcast %cst_61 : f32 to vector<8x64xf32>
    %141 = arith.subf %140, %137 : vector<8x64xf32>
    %142 = arith.select %139, %137, %141 : vector<8x64xi1>, vector<8x64xf32>
    %cst_62 = arith.constant 1.000000e+00 : f32
    %143 = vector.broadcast %cst_62 : f32 to vector<8x64xf32>
    %144 = arith.addf %143, %142 : vector<8x64xf32>
    %145 = arith.mulf %108, %144 : vector<8x64xf32>
    %146 = arith.truncf %145 : vector<8x64xf32> to vector<8x64xbf16>
    %c0_63 = arith.constant 0 : index
    %c0_64 = arith.constant 0 : index
    %c0_65 = arith.constant 0 : index
    %147 = vector.load %arg14[%c0_63, %c0_64, %c0_65] : memref<1x64x32xbf16, #tpu.memory_space<vmem>>, vector<1x64x32xbf16>
    %148 = vector.shape_cast %147 : vector<1x64x32xbf16> to vector<64x32xbf16>
    %cst_66 = arith.constant dense<0.000000e+00> : vector<8x32xf32>
    %149 = tpu.matmul %146, %148, %cst_66 {dimension_numbers = #tpu.dot_dimension_numbers<[1], [0], [0], [1], [0, 0, 1, 1], [], []>} : vector<8x64xbf16>, vector<64x32xbf16>, vector<8x32xf32> -> vector<8x32xf32>
    %c0_67 = arith.constant 0 : index
    %c0_68 = arith.constant 0 : index
    %c0_69 = arith.constant 0 : index
    %150 = vector.load %arg15[%c0_67, %c0_68, %c0_69] : memref<1x1x32xf32, #tpu.memory_space<vmem>>, vector<1x1x32xf32>
    %151 = vector.shape_cast %150 : vector<1x1x32xf32> to vector<1x32xf32>
    %152 = vector.broadcast %151 : vector<1x32xf32> to vector<8x32xf32>
    %153 = arith.addf %149, %152 : vector<8x32xf32>
    %154 = arith.addf %72, %153 : vector<8x32xf32>
    %c0_70 = arith.constant 0 : index
    %c0_71 = arith.constant 0 : index
    %155 = vector.load %arg19[%c0_70, %c0_71] : memref<8x32xf32, #tpu.memory_space<vmem>>, vector<8x32xf32>
    tpu.vector_store %arg19[%c0_70, %c0_71], %154 {strides = array<i32>} : memref<8x32xf32, #tpu.memory_space<vmem>>, vector<8x32xf32>,
    %c1_i32 = arith.constant 1 : i32
    %156 = arith.cmpi eq, %arg1, %c1_i32 : i32
    %157 = arith.extui %156 : i1 to i32
    %c0_i32_72 = arith.constant 0 : i32
    %158 = arith.cmpi ne, %157, %c0_i32_72 : i32
    scf.if %158 {
      %c0_73 = arith.constant 0 : index
      %c0_74 = arith.constant 0 : index
      %159 = vector.load %arg19[%c0_73, %c0_74] : memref<8x32xf32, #tpu.memory_space<vmem>>, vector<8x32xf32>
      %c0_75 = arith.constant 0 : index
      %c0_76 = arith.constant 0 : index
      %160 = vector.load %arg16[%c0_75, %c0_76] : memref<1x32xf32, #tpu.memory_space<vmem>>, vector<1x32xf32>
      %c0_77 = arith.constant 0 : index
      %c0_78 = arith.constant 0 : index
      %161 = vector.load %arg17[%c0_77, %c0_78] : memref<1x32xf32, #tpu.memory_space<vmem>>, vector<1x32xf32>
      %cst_79 = arith.constant dense<0.000000e+00> : vector<8xf32>
      %162 = vector.multi_reduction <add>, %159, %cst_79 [1] : vector<8x32xf32> to vector<8xf32>
      %163 = vector.shape_cast %162 : vector<8xf32> to vector<8x1xf32>
      %cst_80 = arith.constant 3.200000e+01 : f32
      %164 = vector.broadcast %cst_80 : f32 to vector<8x1xf32>
      %165 = arith.divf %163, %164 : vector<8x1xf32>
      %166 = vector.broadcast %165 : vector<8x1xf32> to vector<8x32xf32>
      %167 = arith.subf %159, %166 : vector<8x32xf32>
      %168 = arith.mulf %167, %167 : vector<8x32xf32>
      %cst_81 = arith.constant dense<0.000000e+00> : vector<8xf32>
      %169 = vector.multi_reduction <add>, %168, %cst_81 [1] : vector<8x32xf32> to vector<8xf32>
      %170 = vector.shape_cast %169 : vector<8xf32> to vector<8x1xf32>
      %cst_82 = arith.constant 3.200000e+01 : f32
      %171 = vector.broadcast %cst_82 : f32 to vector<8x1xf32>
      %172 = arith.divf %170, %171 : vector<8x1xf32>
      %173 = vector.broadcast %165 : vector<8x1xf32> to vector<8x32xf32>
      %174 = arith.subf %159, %173 : vector<8x32xf32>
      %cst_83 = arith.constant 9.99999997E-7 : f32
      %175 = vector.broadcast %cst_83 : f32 to vector<8x1xf32>
      %176 = arith.addf %172, %175 : vector<8x1xf32>
      %177 = math.rsqrt %176 : vector<8x1xf32>
      %178 = vector.broadcast %177 : vector<8x1xf32> to vector<8x32xf32>
      %179 = arith.mulf %174, %178 : vector<8x32xf32>
      %180 = vector.broadcast %160 : vector<1x32xf32> to vector<8x32xf32>
      %181 = arith.mulf %179, %180 : vector<8x32xf32>
      %182 = vector.broadcast %161 : vector<1x32xf32> to vector<8x32xf32>
      %183 = arith.addf %181, %182 : vector<8x32xf32>
      %c0_84 = arith.constant 0 : index
      %c0_85 = arith.constant 0 : index
      %c0_86 = arith.constant 0 : index
      %184 = vector.load %arg18[%c0_84, %c0_85, %c0_86] : memref<1x8x32xf32, #tpu.memory_space<vmem>>, vector<1x8x32xf32>
      %185 = vector.shape_cast %184 : vector<1x8x32xf32> to vector<8x32xf32>
      %186 = vector.shape_cast %183 : vector<8x32xf32> to vector<1x8x32xf32>
      tpu.vector_store %arg18[%c0_84, %c0_85, %c0_86], %186 {strides = array<i32>} : memref<1x8x32xf32, #tpu.memory_space<vmem>>, vector<1x8x32xf32>,
    } else {
    }
    return
  }
  func.func @transform_0(%arg0: i32, %arg1: i32) -> (i32, i32, i32) {
    %c0_i32 = arith.constant 0 : i32
    %c0_i32_0 = arith.constant 0 : i32
    %c0_i32_1 = arith.constant 0 : i32
    return %arg0, %c0_i32, %c0_i32_0 : i32, i32, i32
  }
  func.func @transform_1(%arg0: i32, %arg1: i32) -> (i32, i32, i32) {
    %c0_i32 = arith.constant 0 : i32
    %c0_i32_0 = arith.constant 0 : i32
    %c0_i32_1 = arith.constant 0 : i32
    %c0_i32_2 = arith.constant 0 : i32
    return %c0_i32, %c0_i32_0, %c0_i32_1 : i32, i32, i32
  }
  func.func @transform_2(%arg0: i32, %arg1: i32) -> (i32, i32, i32) {
    %c0_i32 = arith.constant 0 : i32
    %c0_i32_0 = arith.constant 0 : i32
    %c0_i32_1 = arith.constant 0 : i32
    return %arg1, %c0_i32, %c0_i32_0 : i32, i32, i32
  }
  func.func @transform_3(%arg0: i32, %arg1: i32) -> (i32, i32, i32) {
    %c0_i32 = arith.constant 0 : i32
    %c0_i32_0 = arith.constant 0 : i32
    %c0_i32_1 = arith.constant 0 : i32
    return %arg1, %c0_i32, %c0_i32_0 : i32, i32, i32
  }
  func.func @transform_4(%arg0: i32, %arg1: i32) -> (i32, i32, i32) {
    %c0_i32 = arith.constant 0 : i32
    %c0_i32_0 = arith.constant 0 : i32
    %c0_i32_1 = arith.constant 0 : i32
    return %arg1, %c0_i32, %c0_i32_0 : i32, i32, i32
  }
  func.func @transform_5(%arg0: i32, %arg1: i32) -> (i32, i32, i32) {
    %c0_i32 = arith.constant 0 : i32
    %c0_i32_0 = arith.constant 0 : i32
    %c0_i32_1 = arith.constant 0 : i32
    return %arg1, %c0_i32, %c0_i32_0 : i32, i32, i32
  }
  func.func @transform_6(%arg0: i32, %arg1: i32) -> (i32, i32, i32) {
    %c0_i32 = arith.constant 0 : i32
    %c0_i32_0 = arith.constant 0 : i32
    %c0_i32_1 = arith.constant 0 : i32
    return %arg1, %c0_i32, %c0_i32_0 : i32, i32, i32
  }
  func.func @transform_7(%arg0: i32, %arg1: i32) -> (i32, i32, i32) {
    %c0_i32 = arith.constant 0 : i32
    %c0_i32_0 = arith.constant 0 : i32
    %c0_i32_1 = arith.constant 0 : i32
    return %arg1, %c0_i32, %c0_i32_0 : i32, i32, i32
  }
  func.func @transform_8(%arg0: i32, %arg1: i32) -> (i32, i32, i32) {
    %c0_i32 = arith.constant 0 : i32
    %c0_i32_0 = arith.constant 0 : i32
    %c0_i32_1 = arith.constant 0 : i32
    return %arg1, %c0_i32, %c0_i32_0 : i32, i32, i32
  }
  func.func @transform_9(%arg0: i32, %arg1: i32) -> (i32, i32, i32) {
    %c0_i32 = arith.constant 0 : i32
    %c0_i32_0 = arith.constant 0 : i32
    %c0_i32_1 = arith.constant 0 : i32
    return %arg1, %c0_i32, %c0_i32_0 : i32, i32, i32
  }
  func.func @transform_10(%arg0: i32, %arg1: i32) -> (i32, i32, i32) {
    %c0_i32 = arith.constant 0 : i32
    %c0_i32_0 = arith.constant 0 : i32
    %c0_i32_1 = arith.constant 0 : i32
    return %arg1, %c0_i32, %c0_i32_0 : i32, i32, i32
  }
  func.func @transform_11(%arg0: i32, %arg1: i32) -> (i32, i32, i32) {
    %c0_i32 = arith.constant 0 : i32
    %c0_i32_0 = arith.constant 0 : i32
    %c0_i32_1 = arith.constant 0 : i32
    return %arg1, %c0_i32, %c0_i32_0 : i32, i32, i32
  }
  func.func @transform_12(%arg0: i32, %arg1: i32) -> (i32, i32, i32) {
    %c0_i32 = arith.constant 0 : i32
    %c0_i32_0 = arith.constant 0 : i32
    %c0_i32_1 = arith.constant 0 : i32
    return %arg1, %c0_i32, %c0_i32_0 : i32, i32, i32
  }
  func.func @transform_13(%arg0: i32, %arg1: i32) -> (i32, i32, i32) {
    %c0_i32 = arith.constant 0 : i32
    %c0_i32_0 = arith.constant 0 : i32
    %c0_i32_1 = arith.constant 0 : i32
    return %arg1, %c0_i32, %c0_i32_0 : i32, i32, i32
  }
  func.func @transform_14(%arg0: i32, %arg1: i32) -> (i32, i32) {
    %c0_i32 = arith.constant 0 : i32
    %c0_i32_0 = arith.constant 0 : i32
    %c0_i32_1 = arith.constant 0 : i32
    return %c0_i32, %c0_i32_0 : i32, i32
  }
  func.func @transform_15(%arg0: i32, %arg1: i32) -> (i32, i32) {
    %c0_i32 = arith.constant 0 : i32
    %c0_i32_0 = arith.constant 0 : i32
    %c0_i32_1 = arith.constant 0 : i32
    return %c0_i32, %c0_i32_0 : i32, i32
  }
  func.func @transform_16(%arg0: i32, %arg1: i32) -> (i32, i32, i32) {
    %c0_i32 = arith.constant 0 : i32
    %c0_i32_0 = arith.constant 0 : i32
    %c0_i32_1 = arith.constant 0 : i32
    return %arg0, %c0_i32, %c0_i32_0 : i32, i32, i32
  }
}

</mosaic_0001>

<bundles_post_ra>
// kernel: tpu_custom_call.1
= control target key start
LH: loop header
LB: loop body
LE: loop exit
PB: predicated region body
PF: predicated region fallthrough
CT: control target
= control target key end

     0   :  { %s4649_s0 = inlined_call_operand.hbm [shape: f32[2,8,32], index: 0, kind: input, shape index: {}]   ;;  %s4650_s1 = inlined_call_operand.hbm [shape: f32[1,8,32], index: 1, kind: input, shape index: {}]   ;;  %s4651_s2 = inlined_call_operand.vmem [shape: f32[2,1,32], index: 2, kind: input, shape index: {}]   ;;  %s4652_s3 = inlined_call_operand.vmem [shape: f32[2,1,32], index: 3, kind: input, shape index: {}]   ;;  %s4653_s4 = inlined_call_operand.vmem [shape: bf16[2,32,96], index: 4, kind: input, shape index: {}]   ;;  %s4654_s5 = inlined_call_operand.vmem [shape: f32[2,1,96], index: 5, kind: input, shape index: {}]   ;;  %s4655_s6 = inlined_call_operand.vmem [shape: bf16[2,32,32], index: 6, kind: input, shape index: {}]   ;;  %s4656_s7 = inlined_call_operand.vmem [shape: f32[2,1,32], index: 7, kind: input, shape index: {}]   ;;  %s4657_s8 = inlined_call_operand.vmem [shape: f32[2,1,32], index: 8, kind: input, shape index: {}]   ;;  %s4658_s9 = inlined_call_operand.vmem [shape: f32[2,1,32], index: 9, kind: input, shape index: {}]   ;;  %s4659_s10 = inlined_call_operand.vmem [shape: bf16[2,32,64], index: 10, kind: input, shape index: {}]   ;;  %s4660_s11 = inlined_call_operand.hbm [shape: f32[2,1,64], index: 11, kind: input, shape index: {}]   ;;  %s4661_s12 = inlined_call_operand.vmem [shape: bf16[2,64,32], index: 12, kind: input, shape index: {}]   ;;  %s4662_s13 = inlined_call_operand.vmem [shape: f32[2,1,32], index: 13, kind: input, shape index: {}]   ;;  %s4663_s14 = inlined_call_operand.vmem [shape: f32[1,32], index: 14, kind: input, shape index: {}]   ;;  %s4664_s15 = inlined_call_operand.vmem [shape: f32[1,32], index: 15, kind: input, shape index: {}]   ;;  %s4665_s16 = inlined_call_operand.hbm [shape: f32[2,8,32], index: 16, kind: output, shape index: {}]  }
   0x1   :  { %4692 = sst [smem:[#allocation30_spill]] %s4649_s0 }
   0x2   :  { %4693 = sst [smem:[#allocation31_spill]] %s4650_s1 }
   0x3   :  { %4694 = sst [smem:[#allocation32_spill]] %s4653_s4 }
   0x4   :  { %4695 = sst [smem:[#allocation33_spill]] %s4655_s6 }
   0x5   :  { %4696 = sst [smem:[#allocation34_spill]] %s4656_s7 }
   0x6   :  { %4697 = sst [smem:[#allocation35_spill]] %s4657_s8 }
   0x7   :  { %4698 = sst [smem:[#allocation36_spill]] %s4658_s9 }
   0x8   :  { %4699 = sst [smem:[#allocation37_spill]] %s4659_s10 }
   0x9   :  { %4700 = sst [smem:[#allocation38_spill]] %s4660_s11 }
   0xa   :  { %4701 = sst [smem:[#allocation39_spill]] %s4661_s12 }
   0xb   :  { %4702 = sst [smem:[#allocation40_spill]] %s4662_s13 }
   0xc   :  { %4703 = sst [smem:[#allocation41_spill]] %s4663_s14 }
   0xd   :  { %4704 = sst [smem:[#allocation42_spill]] %s4664_s15 }
   0xe   :  { %4705 = sst [smem:[#allocation43_spill]] %s4665_s16 }
   0xf   :  { %21 = vsyncpa [#allocation4], 0 }
  0x10   :  { %23 = vsyncpa [#allocation4 + $0x1], 0 }
  0x11   :  { %24 = vsyncpa [#allocation7], 0 }
  0x12   :  { %25 = vsyncpa [#allocation5], 0 }
  0x13   :  { %27 = vsyncpa [#allocation5 + $0x1], 0  ;;  %s3959_s21 = smov 0   ;;  %s3961_s22 = smov 0  }
  0x14   :  { %s3963_s23 = smov 0   ;;  %s3965_s24 = smov 0  }
  0x15   :  { %s3967_s25 = smov 0   ;;  %s3969_s26 = smov 0  }
  0x16   :  { %s3971_s27 = smov 0   ;;  %s3973_s28 = smov 0  }
  0x17   :  { %s3975_s29 = smov 0   ;;  %s3977_s30 = smov 0  }
  0x18   :  { %s3979_s0 = smov 0  }
  0x19 LB: > { %4706 = sst [smem:[#allocation14_spill]] %s3819_s22  ;;  %p59_p0 = scmp.ne.s32.totalorder %s3835_s26, %s3831_s25  ;;  %s3855_s0 = sphi %s3979_s0, %s33_s0   ;;  %s3851_s30 = sphi %s3977_s30, %s4785_s30   ;;  %s3847_s29 = sphi %s3975_s29, %s4784_s29   ;;  %s3843_s28 = sphi %s3973_s28, %s4783_s28   ;;  %s3839_s27 = sphi %s3971_s27, %s4782_s27   ;;  %s3835_s26 = sphi %s3969_s26, %s4781_s26   ;;  %s3831_s25 = sphi %s3967_s25, %s4780_s25   ;;  %s3827_s24 = sphi %s3965_s24, %s4779_s24   ;;  %s3823_s23 = sphi %s3963_s23, %s4778_s23   ;;  %s3819_s22 = sphi %s3961_s22, %s4777_s22   ;;  %s3815_s21 = sphi %s3959_s21, %s4776_s21  }
  0x1a   : > { %4707 = sst [smem:[#allocation15_spill]] %s3823_s23  ;;  %p4669_p1 = scmp.eq.s32.totalorder %s3855_s0, 0 }
  0x1b   : > { %4708 = sst [smem:[#allocation16_spill]] %s3827_s24  ;;  %p4668_p2 = scmp.lt.s32.totalorder %s3855_s0, 4 }
  0x1c   : > { %4709 = sst [smem:[#allocation17_spill]] %s3831_s25  ;;  %p61_p3 = por %p4669_p1, %p59_p0 }
  0x1d   : > { %4710 = sst [smem:[#allocation18_spill]] %s3835_s26  ;;  %s507_s19 = sand.u32 1, %s3855_s0  }
  0x1e   : > { %4711 = sst [smem:[#allocation19_spill]] %s3843_s28  ;;  %s509_s20 = sand.u32 1, %s3835_s26  }
  0x1f   : > { %4712 = sst [smem:[#allocation20_spill]] %s3847_s29  ;;  %s3292_s16 = sshll.u32 %s509_s20, 3 }
  0x20   : > { %4713 = sst [smem:[#allocation21_spill]] %s3851_s30  ;;  %s3293_s28 = sshll.u32 %s3851_s30, 7 }
  0x21   : > { %4714 = sst [smem:[#allocation22_spill]] %s3855_s0  ;;  %s4715_s12 = sld [smem:[#allocation30_spill]] }
  0x22   : > { %s511_s18 = scalar_lea.vmem [#allocation3], %s3292_s16  ;;  %p4035_p4 = pnand %p4668_p2, %p61_p3 }
  0x23   : > { %s518_s17 = sshll.u32 %s511_s18, 4  ;;  %s4041_s20 = scalar_lea.sflag [#allocation4], %s507_s19  ;;  %s4039_s17 = int_to_ptr.vmem [resolvable:$true] %s518_s17 }
  0x24   : > { %p3639_p6 = pneg %p4035_p4 }
  0x27   : > { %s4031_s13 = scalar_lea.hbm %s4715_s12, %s3293_s28  ;;  %s3642_s28 = scalar_lea.hbm %s4715_s12, 256 }
  0x28   : > { %s3637_s14 = scalar_lea.hbm %s4031_s13, 128  ;;  %p3643_p9 = scmp.lt.u32.totalorder %s4031_s13, %s4715_s12 }
  0x29   : > { %p3638_p5 = scmp.ne.s32.totalorder %s4031_s13, %s3637_s14  ;;  %p3644_p10 = scmp.lt.u32.totalorder %s3642_s28, %s3637_s14 }
  0x2a   : > { %p3646_p12 = scmp.lt.u32.totalorder %s3637_s14, %s4031_s13 }
  0x2b   : > { %p3640_p7 = pnand %p3639_p6, %p3638_p5  ;;  %p3645_p11 = por %p3644_p10, %p3643_p9 }
  0x2d   : > { %p3641_p8 = pneg %p3640_p7  ;;  %p3647_p13 = por %p3646_p12, %p3645_p11 }
  0x2f   : > { %p3648_p3 = pnand %p3647_p13, %p3641_p8 }
  0x31   : > { %3651 = shalt.err (!%p3648_p3)
}
  0x32   : > { %s3652_s19 = scalar_lea.vmem %s4039_s17, 128  ;;  %s3857_s15 = smov [#allocation3]  }
  0x33   : > { %p3653_p5 = scmp.ne.s32.totalorder %s4039_s17, %s3652_s19  ;;  %s3657_s16 = sshll.u32 %s3857_s15, 4  ;;  %s3658_s16 = int_to_ptr.vmem [resolvable:$false] %s3657_s16 }
  0x34   : > { %s3659_s9 = scalar_lea.vmem %s3658_s16, 256  ;;  %p3660_p1 = scmp.lt.s32.totalorder %s4039_s17, %s3658_s16 }
  0x35   : > { %p3655_p7 = pnand %p3653_p5, %p3639_p6  ;;  %p3661_p9 = scmp.lt.s32.totalorder %s3659_s9, %s3652_s19 }
  0x37   : > { %p3656_p2 = pneg %p3655_p7  ;;  %p3662_p10 = por %p3661_p9, %p3660_p1 }
  0x39   : > { %p3663_p11 = pnand %p3662_p10, %p3656_p2 }
  0x3b   : > { %3666 = shalt.err (!%p3663_p11)
}
  0x3c   : > { %3486 = dma.hbm_to_vmem [thread:$0]  (!%p4035_p4), %s4031_s13, 128, %s4039_s17, %s4041_s20  }
  0x3d   : > { %s4070_s14 = sadd.s32 4294967295, %s3855_s0   ;;  %s3288_s10 = sadd.s32 4294967294, %s3855_s0  }
  0x3e   : > { %p65_p1 = scmp.ne.s32.totalorder %s3831_s25, %s3827_s24  ;;  %p4675_p2 = scmp.eq.s32.totalorder %s4070_s14, 0 }
  0x3f   : > { %p346_p6 = scmp.ne.s32.totalorder %s3819_s22, %s3815_s21  ;;  %p464_p8 = scmp.eq.s32.totalorder %s4070_s14, 3 }
  0x40   : > { %p4081_p12 = por %p4675_p2, %p65_p1  ;;  %p470_p4 = scmp.eq.s32.totalorder %s3288_s10, 3 }
  0x41   : > { %p4087_p13 = por %p346_p6, %p4675_p2  ;;  %p4094_p3 = por %p464_p8, %p59_p0 }
  0x42   : > { %s4717_s28 = scalar_select %p4081_p12, 1, 0 }
  0x43   : > { %s4718_s13 = scalar_select %p4087_p13, 1, 0 }
  0x44   : > { %s4719_s17 = scalar_select %p4094_p3, 1, 0 }
  0x45   : > { %p4098_p5 = por %p470_p4, %p65_p1  ;;  %p3289_p7 = scmp.ge.s32.totalorder %s3855_s0, 1 }
  0x46   : > { %4720 = sst [smem:[#allocation23_spill]] %s4719_s17  ;;  %p477_p9 = scmp.lt.s32.totalorder %s3855_s0, 5 }
  0x47   : > { %s4721_s21 = scalar_select %p4098_p5, 1, 0 }
  0x48   : > { %p4104_p10 = pnand %p3289_p7, %p477_p9  ;;  %s3858_s19 = smov [#allocation6]  }
  0x49   : > { %4722 = sst [smem:[#allocation24_spill]] %s4721_s21  ;;  %s490_s15 = sshll.u32 %s3858_s19, 4  ;;  %s491_s15 = int_to_ptr.vmem [resolvable:$true] %s490_s15 }
  0x4a   : > { %s4723_s18 = scalar_select %p4104_p10, 1, 0 }
  0x4b   : > { %p3479_p11 = pneg %p4104_p10  ;;  %s42_s16 = sadd.s32 1, %s3847_s29 }
  0x4c   : > { %p4117_p1 = scmp.ge.s32.totalorder %s42_s16, 2  ;;  %s587_s21 = sand.u32 1, %s3823_s23  }
  0x4d   : > { %p4113_p0 = pnand %p3479_p11, %p4675_p2  ;;  %s4726_s1 = sld [smem:[#allocation31_spill]] }
  0x4e   : > { %s4725_s10 = scalar_select %p4117_p1, 1, 0 }
  0x4f   : > { %p3669_p4 = pneg %p4113_p0 }
  0x53   : > { %s3667_s19 = scalar_lea.hbm %s4726_s1, 128 }
  0x54   : > { %p3668_p8 = scmp.ne.s32.totalorder %s4726_s1, %s3667_s19  ;;  %p3674_p11 = scmp.lt.u32.totalorder %s3667_s19, %s4726_s1 }
  0x56   : > { %p3670_p7 = pnand %p3669_p4, %p3668_p8 }
  0x58   : > { %p3671_p9 = pneg %p3670_p7 }
  0x5a   : > { %p3676_p2 = pnand %p3674_p11, %p3671_p9 }
  0x5c   : > { %3679 = shalt.err (!%p3676_p2)
}
  0x5d   : > { %s3680_s12 = scalar_lea.vmem %s491_s15, 128  ;;  %p3688_p13 = scmp.lt.s32.totalorder %s491_s15, %s491_s15 }
  0x5e   : > { %p3681_p6 = scmp.ne.s32.totalorder %s491_s15, %s3680_s12  ;;  %p3689_p12 = scmp.lt.s32.totalorder %s3680_s12, %s3680_s12 }
  0x60   : > { %p3683_p5 = pnand %p3681_p6, %p3669_p4  ;;  %p3690_p10 = por %p3689_p12, %p3688_p13 }
  0x62   : > { %p3684_p3 = pneg %p3683_p5 }
  0x64   : > { %p3691_p1 = pnand %p3690_p10, %p3684_p3 }
  0x66   : > { %3694 = shalt.err (!%p3691_p1)
}
  0x67   : > { %3482 = dma.hbm_to_vmem [thread:$0]  (!%p4113_p0), %s4726_s1, 128, %s491_s15, [#allocation7]  }
  0x68   : > { %p4727_p2 = scmp.ne.s32.totalorder %s4725_s10, 0  ;;  %s4729_s4 = sadd.s32 1, %s3851_s30 }
  0x69   : > { %p4730_p12 = scmp.eq.s32.totalorder %s3855_s0, 0  ;;  %p4731_p13 = scmp.ne.s32.totalorder %s3823_s23, %s3819_s22 }
  0x6a   : > { %s4787_s16 = smov (%p4727_p2, %s42_s16), 0  ;;  %s4789_s4 = smov (!%p4727_p2, %s4729_s4), %s3851_s30 }
  0x6b   : > { %4728 = sst [smem:[#allocation25_spill]] %s4787_s16  ;;  %s330_s6 = ssub.s32 %s3847_s29, %s4787_s16 }
  0x6c   : > { %p342_p3 = por %p4731_p13, %p4730_p12  ;;  %p47_p5 = scmp.ge.s32.totalorder %s4789_s4, 2 }
  0x6d   : > { %p331_p10 = scmp.eq.s32.totalorder %s330_s6, 0  ;;  %s3294_s12 = sshll.u32 %s3847_s29, 4 }
  0x6e   : > { %s4791_s4 = smov (%p47_p5, %s4789_s4), 0  ;;  %s4733_s24 = sadd.s32 1, %s3823_s23 }
  0x6f   : > { %4732 = sst [smem:[#allocation26_spill]] %s4791_s4  ;;  %s49_s15 = ssub.s32 %s3851_s30, %s4791_s4 }
  0x70   : > { %s4163_s17 = scalar_select %p331_p10, %s3823_s23, %s4733_s24  }
  0x71   : > { %s4735_s11 = sld [smem:[#allocation38_spill]]  ;;  %p50_p0 = scmp.eq.s32.totalorder %s49_s15, 0 }
  0x72   : > { %4734 = sst [smem:[#allocation27_spill]] %s4163_s17  ;;  %s588_s7 = scalar_lea.vmem [#allocation8], %s587_s21 }
  0x73   : > { %s595_s8 = sshll.u32 %s588_s7, 4  ;;  %p4736_p1 = scmp.lt.s32.totalorder %s3855_s0, 4  ;;  %s4174_s8 = int_to_ptr.vmem [resolvable:$true] %s595_s8 }
  0x74   : > { %s4738_s24 = sadd.s32 1, %s3835_s26 }
  0x75   : > { %p4178_p6 = pnand %p4736_p1, %p342_p3 }
  0x77   : > { %s4170_s19 = scalar_lea.hbm %s4735_s11, %s3294_s12  ;;  %p3697_p4 = pneg %p4178_p6 }
  0x78   : > { %s4185_s12 = scalar_select %p50_p0, %s3835_s26, %s4738_s24  }
  0x79   : > { %s3695_s9 = scalar_lea.hbm %s4170_s19, 16  ;;  %s3700_s10 = scalar_lea.hbm %s4735_s11, 32 }
  0x7a   : > { %4739 = sst [smem:[#allocation28_spill]] %s4185_s12  ;;  %p3696_p8 = scmp.ne.s32.totalorder %s4170_s19, %s3695_s9 }
  0x7b   : > { %p3701_p11 = scmp.lt.u32.totalorder %s4170_s19, %s4735_s11  ;;  %p3702_p2 = scmp.lt.u32.totalorder %s3700_s10, %s3695_s9 }
  0x7c   : > { %p3698_p7 = pnand %p3697_p4, %p3696_p8  ;;  %p3704_p13 = scmp.lt.u32.totalorder %s3695_s9, %s4170_s19 }
  0x7d   : > { %p3703_p12 = por %p3702_p2, %p3701_p11 }
  0x7e   : > { %p3699_p9 = pneg %p3698_p7 }
  0x7f   : > { %p3705_p3 = por %p3704_p13, %p3703_p12 }
  0x81   : > { %p3706_p5 = pnand %p3705_p3, %p3699_p9 }
  0x83   : > { %3709 = shalt.err (!%p3706_p5)
}
  0x84   : > { %s3710_s24 = scalar_lea.vmem %s4174_s8, 16  ;;  %s3859_s21 = smov [#allocation8]  }
  0x85   : > { %p3711_p10 = scmp.ne.s32.totalorder %s4174_s8, %s3710_s24  ;;  %s3715_s15 = sshll.u32 %s3859_s21, 4  ;;  %s3716_s15 = int_to_ptr.vmem [resolvable:$false] %s3715_s15 }
  0x86   : > { %s3717_s1 = scalar_lea.vmem %s3716_s15, 32  ;;  %p3718_p8 = scmp.lt.s32.totalorder %s4174_s8, %s3716_s15 }
  0x87   : > { %p3713_p0 = pnand %p3711_p10, %p3697_p4  ;;  %p3719_p7 = scmp.lt.s32.totalorder %s3717_s1, %s3710_s24 }
  0x89   : > { %p3714_p1 = pneg %p3713_p0  ;;  %p3720_p11 = por %p3719_p7, %p3718_p8 }
  0x8b   : > { %p3721_p2 = pnand %p3720_p11, %p3714_p1 }
  0x8d   : > { %3724 = shalt.err (!%p3721_p2)
}
  0x8e   : > { %3489 = dma.hbm_to_vmem [thread:$0]  (!%p4178_p6), %s4170_s19, 16, %s4174_s8, %s4041_s20  }
  0x8f   : > { %p4740_p9 = scmp.ne.s32.totalorder %s4723_s18, 0 }
  0x91   : > { %618 = sbr.rel (%p4740_p9) target bundleno = 3865 (0xf19), region = 84 }
  0x98   : > { %s620_s9 = sand.u32 1, %s4070_s14   ;;  %s4681_s10 = sand.u32 1, %s3831_s25  }
  0x99   : > { %s4219_s7 = sshll.u32 %s4681_s10, 3  ;;  %s621_s24 = scalar_lea.sflag [#allocation4], %s620_s9 }
  0x9a   : > { %s624_s21 = scalar_lea.vmem [#allocation3], %s4219_s7  ;;  %p4741_p4 = scmp.ne.s32.totalorder %s4717_s28, 0 }
  0x9c   : > { %3798 = dma.done.wait (%p4741_p4), %s621_s24, 128  }
  0x9d   : > { %3800 = vsyncadd (%p4741_p4), %s621_s24, 4294967168  ;;  %p4742_p6 = scmp.eq.s32.totalorder %s4070_s14, 0 }
  0x9f   : > { %3802 = dma.done.wait (%p4742_p6), [#allocation7], 128   ;;  %p4743_p12 = pmov %p4742_p6 }
  0xa0   : > { %s635_s20 = sand.u32 1, %s3819_s22   ;;  %p4745_p13 = scmp.ne.s32.totalorder %s4718_s13, 0 }
  0xa1   : > { %3804 = vsyncadd (%p4743_p12), [#allocation7], 4294967168  ;;  %s4231_s18 = scalar_lea.vmem [#allocation8], %s635_s20 }
  0xa2   : > { %4744 = sst [smem:[#allocation29_spill]] %s4231_s18 }
  0xa3   : > { %3806 = dma.done.wait (%p4745_p13), %s621_s24, 16  }
  0xa4   : > { %3808 = vsyncadd (%p4745_p13), %s621_s24, 4294967280  ;;  %p730_p3 = scmp.lt.s32.totalorder %s3839_s27, 1  ;;  %s4746_s14 = sld [smem:[#allocation32_spill]] }
  0xa5   : > { %s4747_s30 = sld [smem:[#allocation33_spill]]  ;;  %s4749_s17 = sld [smem:[#allocation35_spill]] }
  0xa6   : > { %s4239_s28 = scalar_select %p730_p3, %s3839_s27, 1 }
  0xa7   : > { %s4750_s20 = sld [smem:[#allocation36_spill]]  ;;  %s4752_s25 = sld [smem:[#allocation40_spill]] }
  0xa8   : > { %s3351_s1 = sshll.u32 %s4239_s28, 4  ;;  %s3354_s16 = sshll.u32 %s4239_s28, 5 }
  0xa9   : > { %s4753_s13 = sld [smem:[#allocation39_spill]]  ;;  %p3307_p5 = scmp.ne.s32.totalorder %s3839_s27, 0 }
  0xaa   : > { %s4257_s11 = scalar_lea.vmem %s4746_s14, %s3351_s1  ;;  %s4751_s14 = sld [smem:[#allocation37_spill]]  ;;  %v776_v0 = vld [vmem:[%s624_s21] sm:$0xff] (!%p3307_p5)  ;;  %v777_v1 = vld [vmem:[#allocation6] sm:$0xff] (!%p3307_p5)  ;;  %vm779_vm0 = vcmask (!%p3307_p5), 261120  }
  0xab   : > { %s4262_s29 = scalar_lea.vmem %s4747_s30, %s3351_s1  ;;  %s754_s23 = scalar_lea.vmem %s4749_s17, %s4239_s28  ;;  %v778_v2 = vadd.f32 (!%p3307_p5), %v777_v1, %v776_v0 }
  0xac   : > { %s729_s17 = scalar_lea.vmem [#allocation9], %s4219_s7  ;;  %775 = sbr.rel (%p3307_p5) target bundleno = 179 (0xb3), region = 100 }
  0xad   : > { %s757_s22 = scalar_lea.vmem %s4750_s20, %s4239_s28  ;;  %s770_s18 = scalar_lea.vmem %s4752_s25, %s4239_s28  ;;  %780 = vst.msk [vmem:[#allocation2] sm:$0xff] (!%p3307_p5), %vm779_vm0, %v778_v2 }
  0xaf   : > { %s4289_s8 = scalar_lea.vmem %s4753_s13, %s3354_s16 }
  0xb0   : > { %s4279_s0 = scalar_lea.vmem %s4751_s14, %s3351_s1 }
  0xb3 PF: > { %vm784_vm1 = vcmask 261120   ;;  %v3600_v10 = vld [vmem:[%s4257_s11] sm:$0xff]   ;;  %v3860_v11 = vmov 0.0   ;;  %vm3861_vm2 = vmmov 0   ;;  %v3601_v12 = vld [vmem:[%s4257_s11 + $0x8] sm:$0xff]   ;;  %s4754_s11 = scalar_lea.vmem %s4651_s2, %s4239_s28  ;;  %s4755_s20 = scalar_lea.vmem %s4652_s3, %s4239_s28  ;;  %v895_v35 = vlaneseq }
  0xb4   : > { %v781_v3 = vld [vmem:[#allocation2] sm:$0xff]  ;;  %3385 = vmatprep.subr.bf16.mxu0 %v3860_v11  ;;  %3389 = vmatprep.mubr.msk.bf16.mxu0 %vm3861_vm2, %v3860_v11  ;;  %s4756_s24 = scalar_lea.vmem %s4654_s5, %s4239_s28  ;;  %s3862_s10 = smov 104   ;;  %v3866_v33 = vmov 1983009808   ;;  %v3867_v40 = vmov 1934713408  }
  0xb5   : > { %v785_v4 = vsel %vm784_vm1, %v781_v3, 0.0  ;;  %3386 = vmatpush3.bf16.msra.mxu0 %v3600_v10  ;;  %3393 = vmatprep.subr.bf16.mxu1 %v3860_v11  ;;  %v3308_v17 = vld [vmem:[%s4754_s11] ss:$0 sm:$0xff]  ;;  %s3863_s19 = smov 120   ;;  %s3864_s14 = smov 112   ;;  %v893_v34 = vunpack.c.l.s4 %v3866_v33  ;;  %v896_v38 = vshrl.u32 %v895_v35, 7  ;;  %v925_v41 = vunpack.c.l.s4 %v3867_v40 }
  0xb6   : > { %786 = vadd.xlane.f32.xlu0 %v785_v4  ;;  %3387 = vmatprep.subr.bf16.mxu0 %v3860_v11  ;;  %v3309_v19 = vld [vmem:[%s4755_s20] ss:$0 sm:$0xff]  ;;  %s3865_s16 = smov 96   ;;  %s3869_s30 = smov 64   ;;  %vm1626_vm3 = vcmask 1043456   ;;  %vm1622_vm4 = vcmask 64512  }
  0xb7   : > { %3395 = vmatprep.mubr.msk.bf16.mxu1 %vm3861_vm2, %v3860_v11  ;;  %v3310_v23 = vld [vmem:[%s4756_s24] ss:$0 sm:$0xff]  ;;  %v894_v37 = vunpack.c.0.s8 %v893_v34  ;;  %v926_v45 = vunpack.c.0.s8 %v925_v41  ;;  %s3871_s4 = smov 8   ;;  %s3872_s12 = smov 24   ;;  %vm2739_vm5 = vcmask 130048   ;;  %vm2741_vm6 = vcmask 195584  }
  0xb8   : > { %s4757_s25 = sld [smem:[#allocation34_spill]]  ;;  %s4761_s9 = sld [smem:[#allocation29_spill]]  ;;  %vm2973_vm8 = vcmask 523264  }
  0xb9   : > { %3388 = vmatpush3.bf16.msra.mxu0 %v3601_v12  ;;  %v4338_v43 = vsub.s32 %v894_v37, %v896_v38  ;;  %v4343_v52 = vsub.s32 %v926_v45, %v896_v38  ;;  %v3868_v45 = vmov 0   ;;  %p3344_p10 = scmp.ne.s32.totalorder %s3839_s27, 1 }
  0xba   : > { %3417 = vmatprep.subr.bf16.mxu0 %v3860_v11 }
  0xbe   : > { %s4758_s21 = scalar_lea.vmem %s4757_s25, %s4239_s28  ;;  %s4763_s28 = sld [smem:[#allocation41_spill]] (!%p3344_p10) }
 0x143   : > { %v787_v5 = vpop.xlane.xlu0 %786 }
 0x144   : > { %v789_v6 = vmul.f32 0.03125, %v787_v5 }
 0x146   : > { %v790_v7 = vsub.f32 %v781_v3, %v789_v6 }
 0x148   : > { %v791_v8 = vmul.f32 %v790_v7, %v790_v7 }
 0x14a   : > { %v792_v9 = vsel %vm784_vm1, %v791_v8, 0.0 }
 0x14b   : > { %793 = vadd.xlane.f32.xlu0 %v792_v9 }
 0x1d8   : > { %v794_v13 = vpop.xlane.xlu0 %793 }
 0x1d9   : > { %v795_v14 = vmul.f32 0.03125, %v794_v13 }
 0x1db   : > { %v796_v15 = vadd.f32 1e-06, %v795_v14 }
 0x1dd   : > { %3610 = vrsqrt.f32 %v796_v15 }
 0x1e7   : > { %v3611_v16 = vpop.eup %3610 }
 0x1e8   : > { %v798_v18 = vmul.f32 %v3611_v16, %v790_v7 }
 0x1ea   : > { %v805_v20 = vmul.f32 %v3308_v17, %v798_v18 }
 0x1ec   : > { %v812_v21 = vadd.f32 %v3309_v19, %v805_v20 }
 0x1ee   : > { %v813_v22 = vpack.c.bf16 %v812_v21, %v812_v21 }
 0x1f0   : > { %3390 = vmatmul.mubr.msk.bf16.vlgmr.msra.gmra.mrb[0].mxu0 %vm784_vm1, %v813_v22 }
 0x1f1   : > { %3419 = vmatprep.mubr.msk.bf16.mxu0 %vm3861_vm2, %v3860_v11 }
 0x2c3   : > { %v874_v24 = vpop.f32.mrb[0].mxu0 }
 0x2c4   : > { %v4323_v25 = vadd.f32 %v3310_v23, %v874_v24  ;;  %v3391_v26 = vpop.f32.mrb[1].mxu0 }
 0x2c5   : > { %v877_v27 = vpop.f32.mrb[2].mxu0 }
 0x2c6   : > { %887 = vrot.lane.b32.xlu0 %v4323_v25, %s3862_s10  ;;  %881 = vrot.lane.b32.xlu1 %v4323_v25, %s3863_s19  ;;  %v3392_v28 = vpop.f32.mrb[3].mxu0  ;;  %s4764_s19 = sld [smem:[#allocation42_spill]] (!%p3344_p10) }
 0x2ca   : > { %884 = vrot.lane.b32.xlu1 %v4323_v25, %s3864_s14 }
 0x2ce   : > { %966 = vrot.lane.b32.xlu1 %v4323_v25, %s3865_s16 }
 0x338   : > { %v4329_v29 = vpop.permute.xlu1 %881  ;;  %v4335_v31 = vpop.permute.xlu0 %887 }
 0x339   : > { %968 = vrot.lane.b32.xlu1 %v4329_v29, %s3865_s16 }
 0x33c   : > { %v4332_v30 = vpop.permute.xlu1 %884 }
 0x33d   : > { %970 = vrot.lane.b32.xlu1 %v4332_v30, %s3865_s16 }
 0x340   : > { %v967_v32 = vpop.permute.xlu1 %966 }
 0x341   : > { %972 = vrot.lane.b32.xlu1 %v4335_v31, %s3865_s16 }
 0x3ab   : > { %v969_v36 = vpop.permute.xlu1 %968 }
 0x3af   : > { %v971_v39 = vpop.permute.xlu1 %970 }
 0x3b0   : > { %v978_v42 = vcombine.low %v967_v32, %v971_v39  ;;  %v979_v46 = vcombine.high %v967_v32, %v971_v39 }
 0x3b2   : > { %v986_v49 = vrot.slane %v978_v42, %v4338_v43  ;;  %v993_v53 = vrot.slane %v979_v46, %v4338_v43 }
 0x3b3   : > { %v973_v44 = vpop.permute.xlu1 %972 }
 0x3b4   : > { %v994_v47 = vcombine.low %v969_v36, %v973_v44  ;;  %v995_v48 = vcombine.high %v969_v36, %v973_v44 }
 0x3b6   : > { %v1002_v50 = vrot.slane %v994_v47, %v4338_v43  ;;  %v1009_v51 = vrot.slane %v995_v48, %v4338_v43 }
 0x3b8   : > { %v1010_v54 = vcombine.low %v986_v49, %v1002_v50  ;;  %v1011_v55 = vcombine.high %v986_v49, %v1002_v50  ;;  %v1026_v58 = vcombine.low %v993_v53, %v1009_v51  ;;  %v1027_v0 = vcombine.high %v993_v53, %v1009_v51 }
 0x3ba   : > { %v1018_v56 = vrot.slane %v1010_v54, %v4343_v52  ;;  %v1025_v57 = vrot.slane %v1011_v55, %v4343_v52  ;;  %v1034_v63 = vrot.slane %v1026_v58, %v4343_v52  ;;  %v1041_v4 = vrot.slane %v1027_v0, %v4343_v52 }
 0x3bb   : > { %v906_v0 = vcombine.low %v4329_v29, %v4335_v31 }
 0x3bc   : > { %v1046_v59 = vpack.c.bf16 %v1018_v56, %v1018_v56  ;;  %v1042_v60 = vcombine.high %v1018_v56, %v3860_v11  ;;  %v1043_v62 = vcombine.high %v1025_v57, %v3860_v11  ;;  %v1048_v1 = vpack.c.bf16 %v1025_v57, %v1025_v57 }
 0x3bd   : > { %v1044_v3 = vcombine.high %v1034_v63, %v3860_v11  ;;  %v1050_v5 = vpack.c.bf16 %v1034_v63, %v1034_v63  ;;  %v1045_v7 = vcombine.high %v1041_v4, %v3860_v11  ;;  %v1052_v8 = vpack.c.bf16 %v1041_v4, %v1041_v4 }
 0x3be   : > { %1204 = vxpose.xlu1.c.b16.start.end [1/1] (short) (narrow) %v1046_v59, 16  ;;  %v1047_v61 = vpack.c.bf16 %v1042_v60, %v1042_v60  ;;  %v1049_v2 = vpack.c.bf16 %v1043_v62, %v1043_v62  ;;  %v890_v62 = vcombine.low %v4323_v25, %v4332_v30  ;;  %v891_v63 = vcombine.high %v4323_v25, %v4332_v30 }
 0x3bf   : > { %v1051_v6 = vpack.c.bf16 %v1044_v3, %v1044_v3  ;;  %v1053_v9 = vpack.c.bf16 %v1045_v7, %v1045_v7  ;;  %v914_v4 = vrot.slane %v906_v0, %v4338_v43 }
 0x3c0   : > { %1220 = vxpose.xlu0.c.b16.start.end [1/1] (short) (narrow) %v1047_v61, 16  ;;  %v905_v3 = vrot.slane %v891_v63, %v4338_v43 }
 0x3c2   : > { %1236 = vxpose.xlu1.c.b16.start.end [1/1] (short) (narrow) %v1048_v1, 16  ;;  %v907_v1 = vcombine.high %v4329_v29, %v4335_v31 }
 0x3c4   : > { %1252 = vxpose.xlu0.c.b16.start.end [1/1] (short) (narrow) %v1049_v2, 16  ;;  %v898_v2 = vrot.slane %v890_v62, %v4338_v43 }
 0x3c6   : > { %1268 = vxpose.xlu1.c.b16.start.end [1/1] (short) (narrow) %v1050_v5, 16  ;;  %v921_v5 = vrot.slane %v907_v1, %v4338_v43 }
 0x3c8   : > { %1284 = vxpose.xlu0.c.b16.start.end [1/1] (short) (narrow) %v1051_v6, 16  ;;  %v922_v6 = vcombine.low %v898_v2, %v914_v4  ;;  %v938_v7 = vcombine.low %v905_v3, %v921_v5 }
 0x3ca   : > { %1300 = vxpose.xlu1.c.b16.start.end [1/1] (short) (narrow) %v1052_v8, 16  ;;  %v923_v8 = vcombine.high %v898_v2, %v914_v4 }
 0x3cc   : > { %1316 = vxpose.xlu0.c.b16.start.end [1/1] (short) (narrow) %v1053_v9, 16  ;;  %v939_v9 = vcombine.high %v905_v3, %v921_v5 }
 0x424   : > { %v1212_v10 = vpop.trf.xlu1 }
 0x426   : > { %v1228_v12 = vpop.trf.xlu0 }
 0x428   : > { %v1244_v13 = vpop.trf.xlu1 }
 0x42a   : > { %v1260_v14 = vpop.trf.xlu0 }
 0x42c   : > { %v1276_v15 = vpop.trf.xlu1 }
 0x42d   : > { %v1332_v17 = vcombine.low %v1212_v10, %v1276_v15 }
 0x42e   : > { %v1292_v16 = vpop.trf.xlu0 }
 0x42f   : > { %v1366_v19 = vcombine.low %v1228_v12, %v1292_v16  ;;  %v1339_v22 = vrot.slane %v1332_v17, %v4338_v43 }
 0x430   : > { %v1308_v18 = vpop.trf.xlu1 }
 0x431   : > { %v1340_v20 = vcombine.low %v1244_v13, %v1308_v18  ;;  %v1373_v26 = vrot.slane %v1366_v19, %v4338_v43  ;;  %v953_v13 = vrot.slane %v939_v9, %v4343_v52 }
 0x432   : > { %v1324_v21 = vpop.trf.xlu0 }
 0x433   : > { %v1347_v23 = vrot.slane %v1340_v20, %v4338_v43  ;;  %v1374_v24 = vcombine.low %v1260_v14, %v1324_v21  ;;  %v957_v19 = vcombine.high %v953_v13, %v3860_v11 }
 0x435   : > { %v1348_v27 = vcombine.low %v1339_v22, %v1347_v23  ;;  %v1381_v28 = vrot.slane %v1374_v24, %v4338_v43  ;;  %v1349_v32 = vcombine.high %v1339_v22, %v1347_v23 }
 0x437   : > { %v1382_v33 = vcombine.low %v1373_v26, %v1381_v28  ;;  %v1383_v34 = vcombine.high %v1373_v26, %v1381_v28  ;;  %v1356_v35 = vrot.slane %v1348_v27, %v4343_v52  ;;  %v1363_v41 = vrot.slane %v1349_v32, %v4343_v52 }
 0x439   : > { %v1390_v36 = vrot.slane %v1382_v33, %v4343_v52  ;;  %v1397_v37 = vrot.slane %v1383_v34, %v4343_v52  ;;  %v1404_v39 = vshrl.u32 %v1356_v35, 16  ;;  %v1420_v48 = vshrl.u32 %v1363_v41, 16 }
 0x43a   : > { %v1364_v49 = vcombine.high %v1356_v35, %v3868_v45  ;;  %v1365_v56 = vcombine.high %v1363_v41, %v3868_v45 }
 0x43b   : > { %v1402_v38 = vpack.i.b16 %v1390_v36, %v1356_v35  ;;  %v1405_v40 = vshrl.u32 %v1390_v36, 16  ;;  %v1421_v44 = vshrl.u32 %v1397_v37, 16  ;;  %v1398_v46 = vcombine.high %v1390_v36, %v3868_v45 }
 0x43c   : > { %v1418_v47 = vpack.i.b16 %v1397_v37, %v1363_v41  ;;  %v1399_v53 = vcombine.high %v1397_v37, %v3868_v45  ;;  %v1412_v55 = vshrl.u32 %v1364_v49, 16  ;;  %v1428_v60 = vshrl.u32 %v1365_v56, 16 }
 0x43d   : > { %1432 = vxpose.xlu1.c.b16.start.end [1/1] (short) (narrow) %v1402_v38, 16  ;;  %v1406_v42 = vpack.i.b16 %v1405_v40, %v1404_v39  ;;  %v1422_v50 = vpack.i.b16 %v1421_v44, %v1420_v48  ;;  %v1413_v51 = vshrl.u32 %v1398_v46, 16  ;;  %v1410_v54 = vpack.i.b16 %v1398_v46, %v1364_v49 }
 0x43e   : > { %v1429_v58 = vshrl.u32 %v1399_v53, 16  ;;  %v1426_v59 = vpack.i.b16 %v1399_v53, %v1365_v56 }
 0x43f   : > { %1448 = vxpose.xlu0.c.b16.start.end [1/1] (short) (narrow) %v1406_v42, 16  ;;  %v1414_v57 = vpack.i.b16 %v1413_v51, %v1412_v55 }
 0x440   : > { %v1430_v61 = vpack.i.b16 %v1429_v58, %v1428_v60 }
 0x441   : > { %1496 = vxpose.xlu1.c.b16.start.end [1/1] (short) (narrow) %v1418_v47, 16 }
 0x443   : > { %1512 = vxpose.xlu0.c.b16.start.end [1/1] (short) (narrow) %v1422_v50, 16 }
 0x445   : > { %1464 = vxpose.xlu1.c.b16.start.end [1/1] (short) (narrow) %v1410_v54, 16 }
 0x447   : > { %1480 = vxpose.xlu0.c.b16.start.end [1/1] (short) (narrow) %v1414_v57, 16 }
 0x449   : > { %1528 = vxpose.xlu1.c.b16.start.end [1/1] (short) (narrow) %v1426_v59, 16 }
 0x44b   : > { %1544 = vxpose.xlu0.c.b16.start.end [1/1] (short) (narrow) %v1430_v61, 16 }
 0x44d   : > { %1054 = vrot.lane.b32.xlu1 %v4323_v25, %s3869_s30  ;;  %v930_v25 = vrot.slane %v922_v6, %v4343_v52 }
 0x44f   : > { %v954_v15 = vcombine.high %v930_v25, %v3860_v11 }
 0x451   : > { %1058 = vrot.lane.b32.xlu1 %v4332_v30, %s3869_s30  ;;  %v946_v30 = vrot.slane %v938_v7, %v4343_v52 }
 0x453   : > { %v956_v16 = vcombine.high %v946_v30, %v3860_v11  ;;  %v3314_v26 = vpack.c.bf16 %v946_v30, %v930_v25 }
 0x454   : > { %1056 = vrot.lane.b32.xlu0 %v4329_v29, %s3869_s30  ;;  %v937_v29 = vrot.slane %v923_v8, %v4343_v52 }
 0x455   : > { %v3316_v21 = vpack.c.bf16 %v956_v16, %v954_v15  ;;  %v1149_v40 = vrot.slane %v3314_v26, %v4338_v43 }
 0x456   : > { %v955_v18 = vcombine.high %v937_v29, %v3860_v11  ;;  %v3315_v28 = vpack.c.bf16 %v953_v13, %v937_v29 }
 0x457   : > { %v1174_v35 = vrot.slane %v3316_v21, %v4338_v43 }
 0x458   : > { %v3317_v23 = vpack.c.bf16 %v957_v19, %v955_v18  ;;  %v1157_v41 = vrot.slane %v3315_v28, %v4338_v43 }
 0x45a   : > { %v1182_v39 = vrot.slane %v3317_v23, %v4338_v43  ;;  %v1158_v51 = vcombine.low %v1149_v40, %v1157_v41 }
 0x45c   : > { %v1183_v49 = vcombine.low %v1174_v35, %v1182_v39  ;;  %v1165_v58 = vrot.slane %v1158_v51, %v4343_v52 }
 0x45e   : > { %v1190_v54 = vrot.slane %v1183_v49, %v4343_v52  ;;  %v1195_v1 = vshrl.u32 %v1165_v58, 16  ;;  %v1166_v8 = vcombine.high %v1165_v58, %v3868_v45 }
 0x460   : > { %v1194_v60 = vpack.i.b16 %v1190_v54, %v1165_v58  ;;  %v1196_v63 = vshrl.u32 %v1190_v54, 16  ;;  %v1191_v6 = vcombine.high %v1190_v54, %v3868_v45 }
 0x462   : > { %v1197_v3 = vpack.i.b16 %v1196_v63, %v1195_v1  ;;  %v1202_v30 = vshrl.u32 %v1191_v6, 16 }
 0x4a3   : > { %v1440_v10 = vpop.trf.xlu1 }
 0x4a5   : > { %v1456_v12 = vpop.trf.xlu0 }
 0x4a7   : > { %v1504_v14 = vpop.trf.xlu1 }
 0x4a8   : > { %v1560_v24 = vcombine.low %v1440_v10, %v1504_v14  ;;  %v1200_v10 = vpack.i.b16 %v1191_v6, %v1166_v8 }
 0x4a9   : > { %v1520_v17 = vpop.trf.xlu0 }
 0x4aa   : > { %v1585_v32 = vcombine.low %v1456_v12, %v1520_v17  ;;  %v1567_v36 = vrot.slane %v1560_v24, %v4338_v43  ;;  %v1201_v12 = vshrl.u32 %v1166_v8, 16 }
 0x4ab   : > { %v1472_v20 = vpop.trf.xlu1 }
 0x4ac   : > { %v1592_v42 = vrot.slane %v1585_v32, %v4338_v43  ;;  %v1203_v29 = vpack.i.b16 %v1202_v30, %v1201_v12 }
 0x4ad   : > { %v1488_v22 = vpop.trf.xlu0 }
 0x4af   : > { %v1536_v27 = vpop.trf.xlu1 }
 0x4b0   : > { %v1568_v33 = vcombine.low %v1472_v20, %v1536_v27 }
 0x4b1   : > { %v1552_v34 = vpop.trf.xlu0 }
 0x4b2   : > { %v1575_v37 = vrot.slane %v1568_v33, %v4338_v43  ;;  %v1593_v38 = vcombine.low %v1488_v22, %v1552_v34 }
 0x4b4   : > { %v1576_v44 = vcombine.low %v1567_v36, %v1575_v37  ;;  %v1600_v46 = vrot.slane %v1593_v38, %v4338_v43 }
 0x4b6   : > { %v1583_v47 = vrot.slane %v1576_v44, %v4343_v52  ;;  %v1601_v48 = vcombine.low %v1592_v42, %v1600_v46 }
 0x4b8   : > { %v1608_v50 = vrot.slane %v1601_v48, %v4343_v52  ;;  %v1613_v55 = vshrl.u32 %v1583_v47, 16  ;;  %v1584_v0 = vcombine.high %v1583_v47, %v3868_v45 }
 0x4ba   : > { %v1612_v53 = vpack.i.b16 %v1608_v50, %v1583_v47  ;;  %v1614_v56 = vshrl.u32 %v1608_v50, 16  ;;  %v1609_v62 = vcombine.high %v1608_v50, %v3868_v45  ;;  %v1619_v7 = vshrl.u32 %v1584_v0, 16 }
 0x4bc   : > { %v1628_v57 = vsel %vm1626_vm3, %v1612_v53, 0  ;;  %v1615_v59 = vpack.i.b16 %v1614_v56, %v1613_v55  ;;  %v1618_v2 = vpack.i.b16 %v1609_v62, %v1584_v0  ;;  %v1620_v5 = vshrl.u32 %v1609_v62, 16 }
 0x4bd   : > { %3394 = vmatpush3.bf16.msra.mxu1 %v1628_v57 }
 0x4be   : > { %3399 = vmatprep.subr.bf16.mxu1 %v3860_v11  ;;  %v1674_v61 = vsel %vm1626_vm3, %v1615_v59, 0  ;;  %v1720_v4 = vsel %vm1626_vm3, %v1618_v2, 0  ;;  %v1621_v9 = vpack.i.b16 %v1620_v5, %v1619_v7 }
 0x4bf   : > { %v1055_v37 = vpop.permute.xlu1 %1054 }
 0x4c0   : > { %3396 = vmatmul.mubr.msk.bf16.vlgmr.msra.gmra.mrb[0].mxu1 %vm1622_vm4, %v1194_v60  ;;  %v1766_v25 = vsel %vm1626_vm3, %v1621_v9, 0 }
 0x4c1   : > { %3400 = vmatpush3.bf16.msra.mxu1 %v1674_v61  ;;  %3401 = vmatprep.mubr.msk.bf16.mxu1 %vm3861_vm2, %v3860_v11 }
 0x4c2   : > { %3405 = vmatprep.subr.bf16.mxu1 %v3860_v11 }
 0x4c3   : > { %v1059_v38 = vpop.permute.xlu1 %1058 }
 0x4c4   : > { %v1066_v40 = vcombine.low %v1055_v37, %v1059_v38  ;;  %v1067_v44 = vcombine.high %v1055_v37, %v1059_v38 }
 0x4c6   : > { %v1057_v41 = vpop.permute.xlu0 %1056  ;;  %v1074_v47 = vrot.slane %v1066_v40, %v4338_v43  ;;  %v1081_v50 = vrot.slane %v1067_v44, %v4338_v43 }
 0x4c8   : > { %3402 = vmatmul.mubr.msk.bf16.vlgmr.msra.gmra.mrb[4].mxu1 %vm1622_vm4, %v1197_v3 }
 0x4c9   : > { %3406 = vmatpush3.bf16.msra.mxu1 %v1720_v4  ;;  %3407 = vmatprep.mubr.msk.bf16.mxu1 %vm3861_vm2, %v3860_v11 }
 0x4ca   : > { %3411 = vmatprep.subr.bf16.mxu1 %v3860_v11 }
 0x4d0   : > { %3408 = vmatmul.mubr.msk.bf16.vlgmr.msra.gmra.mrb[8].mxu1 %vm1622_vm4, %v1200_v10 }
 0x4d1   : > { %3412 = vmatpush3.bf16.msra.mxu1 %v1766_v25  ;;  %3413 = vmatprep.mubr.msk.bf16.mxu1 %vm3861_vm2, %v3860_v11 }
 0x4d2   : > { %3423 = vmatprep.subr.bf16.mxu1 %v3860_v11 }
 0x4d8   : > { %3414 = vmatmul.mubr.msk.bf16.vlgmr.msra.gmra.mrb[12].mxu1 %vm1622_vm4, %v1203_v29 }
 0x4d9   : > { %3425 = vmatprep.mubr.msk.bf16.mxu1 %vm3861_vm2, %v3860_v11 }
 0x593   : > { %v1664_v13 = vpop.f32.mrb[0].mxu1 }
 0x594   : > { %v4428_v14 = vmul.f32 0.35355338, %v1664_v13  ;;  %v3397_v15 = vpop.f32.mrb[1].mxu1 }
 0x595   : > { %v1667_v16 = vpop.f32.mrb[2].mxu1 }
 0x596   : > { %v3398_v17 = vpop.f32.mrb[3].mxu1  ;;  %v1812_v18 = vsel %vm1622_vm4, %v4428_v14, -inf }
 0x597   : > { %1813 = vmax.xlane.f32.xlu1 %v1812_v18 }
 0x59b   : > { %v1710_v19 = vpop.f32.mrb[4].mxu1 }
 0x59c   : > { %v3403_v20 = vpop.f32.mrb[5].mxu1  ;;  %v4448_v62 = vmul.f32 0.35355338, %v1710_v19 }
 0x59d   : > { %v1713_v21 = vpop.f32.mrb[6].mxu1 }
 0x59e   : > { %v3404_v22 = vpop.f32.mrb[7].mxu1  ;;  %v1815_v0 = vsel %vm1622_vm4, %v4448_v62, -inf }
 0x5a3   : > { %v1756_v23 = vpop.f32.mrb[8].mxu1 }
 0x5a4   : > { %v3409_v24 = vpop.f32.mrb[9].mxu1  ;;  %v4434_v35 = vmul.f32 0.35355338, %v1756_v23 }
 0x5a5   : > { %v1759_v26 = vpop.f32.mrb[10].mxu1 }
 0x5a6   : > { %v3410_v27 = vpop.f32.mrb[11].mxu1  ;;  %v1818_v36 = vsel %vm1622_vm4, %v4434_v35, -inf }
 0x5a8   : > { %1060 = vrot.lane.b32.xlu1 %v4335_v31, %s3869_s30 }
 0x5ab   : > { %v1802_v28 = vpop.f32.mrb[12].mxu1 }
 0x5ac   : > { %v3415_v32 = vpop.f32.mrb[13].mxu1  ;;  %v4453_v4 = vmul.f32 0.35355338, %v1802_v28 }
 0x5ad   : > { %v1805_v33 = vpop.f32.mrb[14].mxu1 }
 0x5ae   : > { %v3416_v34 = vpop.f32.mrb[15].mxu1  ;;  %v1821_v5 = vsel %vm1622_vm4, %v4453_v4, -inf }
 0x5cc   : > { %1819 = vmax.xlane.f32.xlu1 %v1818_v36 }
 0x624   : > { %v4438_v39 = vpop.xlane.xlu1 %1813 }
 0x628   : > { %v1061_v42 = vpop.permute.xlu1 %1060 }
 0x629   : > { %v1082_v46 = vcombine.low %v1057_v41, %v1061_v42  ;;  %v1083_v31 = vcombine.high %v1057_v41, %v1061_v42 }
 0x62b   : > { %v1090_v48 = vrot.slane %v1082_v46, %v4338_v43  ;;  %v1097_v49 = vrot.slane %v1083_v31, %v4338_v43 }
 0x62d   : > { %v1098_v51 = vcombine.low %v1074_v47, %v1090_v48  ;;  %v1114_v54 = vcombine.low %v1081_v50, %v1097_v49  ;;  %v1115_v59 = vcombine.high %v1081_v50, %v1097_v49  ;;  %v1099_v1 = vcombine.high %v1074_v47, %v1090_v48 }
 0x62e   : > { %v1824_v48 = vsub.f32 %v4428_v14, %v4438_v39 }
 0x62f   : > { %v1106_v53 = vrot.slane %v1098_v51, %v4343_v52  ;;  %v1122_v58 = vrot.slane %v1114_v54, %v4343_v52  ;;  %v1129_v61 = vrot.slane %v1115_v59, %v4343_v52  ;;  %v1113_v2 = vrot.slane %v1099_v1, %v4343_v52 }
 0x631   : > { %v1134_v55 = vpack.c.bf16 %v1106_v53, %v1106_v53  ;;  %v1130_v56 = vcombine.high %v1106_v53, %v3860_v11  ;;  %v1138_v60 = vpack.c.bf16 %v1122_v58, %v1122_v58  ;;  %v1140_v63 = vpack.c.bf16 %v1129_v61, %v1129_v61 }
 0x632   : > { %v1136_v3 = vpack.c.bf16 %v1113_v2, %v1113_v2  ;;  %v1131_v6 = vcombine.high %v1113_v2, %v3860_v11  ;;  %v1132_v8 = vcombine.high %v1122_v58, %v3860_v11  ;;  %v1133_v10 = vcombine.high %v1129_v61, %v3860_v11 }
 0x633   : > { %1860 = vxpose.xlu0.c.b16.start.end [1/1] (short) (narrow) %v1134_v55, 16  ;;  %v1135_v57 = vpack.c.bf16 %v1130_v56, %v1130_v56 }
 0x634   : > { %v1137_v7 = vpack.c.bf16 %v1131_v6, %v1131_v6  ;;  %v1139_v9 = vpack.c.bf16 %v1132_v8, %v1132_v8  ;;  %v1141_v25 = vpack.c.bf16 %v1133_v10, %v1133_v10 }
 0x635   : > { %1876 = vxpose.xlu1.c.b16.start.end [1/1] (short) (narrow) %v1135_v57, 16  ;;  %v1828_v57 = vmul.f32 1.442695, %v1824_v48 }
 0x637   : > { %3612 = vpow2.f32 %v1828_v57 }
 0x639   : > { %1924 = vxpose.xlu1.c.b16.start.end [1/1] (short) (narrow) %v1138_v60, 16 }
 0x63d   : > { %1956 = vxpose.xlu1.c.b16.start.end [1/1] (short) (narrow) %v1140_v63, 16 }
 0x640   : > { %1816 = vmax.xlane.f32.xlu0 %v1815_v0 }
 0x641   : > { %v3613_v2 = vpop.eup %3612 }
 0x659   : > { %v1820_v30 = vpop.xlane.xlu1 %1819 }
 0x65a   : > { %v1826_v58 = vsub.f32 %v4434_v35, %v1820_v30 }
 0x65c   : > { %v1832_v0 = vmul.f32 1.442695, %v1826_v58 }
 0x66d   : > { %1892 = vxpose.xlu0.c.b16.start.end [1/1] (short) (narrow) %v1136_v3, 16  ;;  %v1836_v3 = vsel %vm1622_vm4, %v3613_v2, 0.0 }
 0x67a   : > { %1822 = vmax.xlane.f32.xlu0 %v1821_v5 }
 0x699   : > { %v1868_v12 = vpop.trf.xlu0 }
 0x69b   : > { %v1884_v29 = vpop.trf.xlu1 }
 0x69f   : > { %v1932_v15 = vpop.trf.xlu1 }
 0x6a0   : > { %v1988_v19 = vcombine.low %v1868_v12, %v1932_v15 }
 0x6a2   : > { %v1995_v22 = vrot.slane %v1988_v19, %v4338_v43 }
 0x6a3   : > { %v1964_v18 = vpop.trf.xlu1 }
 0x6a7   : > { %1908 = vxpose.xlu0.c.b16.start.end [1/1] (short) (narrow) %v1137_v7, 16 }
 0x6ab   : > { %1940 = vxpose.xlu0.c.b16.start.end [1/1] (short) (narrow) %v1139_v9, 16 }
 0x6af   : > { %1972 = vxpose.xlu0.c.b16.start.end [1/1] (short) (narrow) %v1141_v25, 16 }
 0x6cd   : > { %v1817_v13 = vpop.xlane.xlu0 %1816 }
 0x6ce   : > { %v1825_v53 = vsub.f32 %v4448_v62, %v1817_v13 }
 0x6d0   : > { %v1830_v61 = vmul.f32 1.442695, %v1825_v53 }
 0x6d2   : > { %3614 = vpow2.f32 %v1830_v61 }
 0x6d3   : > { %v1900_v16 = vpop.trf.xlu0  ;;  %3616 = vpow2.f32 %v1832_v0 }
 0x6d4   : > { %v1996_v20 = vcombine.low %v1900_v16, %v1964_v18 }
 0x6d6   : > { %v2003_v23 = vrot.slane %v1996_v20, %v4338_v43 }
 0x6d8   : > { %v2004_v27 = vcombine.low %v1995_v22, %v2003_v23  ;;  %v2005_v41 = vcombine.high %v1995_v22, %v2003_v23 }
 0x6da   : > { %v2012_v36 = vrot.slane %v2004_v27, %v4343_v52  ;;  %v2019_v56 = vrot.slane %v2005_v41, %v4343_v52 }
 0x6dc   : > { %v2060_v42 = vshrl.u32 %v2012_v36, 16  ;;  %v2020_v31 = vcombine.high %v2012_v36, %v3868_v45  ;;  %v2076_v63 = vshrl.u32 %v2019_v56, 16  ;;  %v3615_v35 = vpop.eup %3614  ;;  %v2021_v10 = vcombine.high %v2019_v56, %v3868_v45 }
 0x6dd   : > { %v3617_v5 = vpop.eup %3616 }
 0x6de   : > { %v2068_v55 = vshrl.u32 %v2020_v31, 16  ;;  %v1842_v7 = vsel %vm1622_vm4, %v3617_v5, 0.0  ;;  %v2084_v12 = vshrl.u32 %v2021_v10, 16 }
 0x707   : > { %v1823_v17 = vpop.xlane.xlu0 %1822 }
 0x708   : > { %v1827_v14 = vsub.f32 %v4453_v4, %v1823_v17  ;;  %v1839_v4 = vsel %vm1622_vm4, %v3615_v35, 0.0 }
 0x70a   : > { %v1834_v1 = vmul.f32 1.442695, %v1827_v14 }
 0x70c   : > { %3618 = vpow2.f32 %v1834_v1 }
 0x70d   : > { %v1916_v21 = vpop.trf.xlu0 }
 0x711   : > { %v1948_v24 = vpop.trf.xlu0 }
 0x712   : > { %v2022_v26 = vcombine.low %v1884_v29, %v1948_v24 }
 0x714   : > { %v2029_v33 = vrot.slane %v2022_v26, %v4338_v43 }
 0x715   : > { %v1980_v28 = vpop.trf.xlu0 }
 0x716   : > { %v2030_v32 = vcombine.low %v1916_v21, %v1980_v28  ;;  %v3619_v6 = vpop.eup %3618 }
 0x717   : > { %v1845_v8 = vsel %vm1622_vm4, %v3619_v6, 0.0 }
 0x718   : > { %v2037_v34 = vrot.slane %v2030_v32, %v4338_v43 }
 0x71a   : > { %v2038_v37 = vcombine.low %v2029_v33, %v2037_v34  ;;  %v2039_v38 = vcombine.high %v2029_v33, %v2037_v34 }
 0x71c   : > { %v2046_v40 = vrot.slane %v2038_v37, %v4343_v52  ;;  %v2053_v51 = vrot.slane %v2039_v38, %v4343_v52 }
 0x71e   : > { %v2058_v44 = vpack.i.b16 %v2046_v40, %v2012_v36  ;;  %v2061_v46 = vshrl.u32 %v2046_v40, 16  ;;  %v2054_v47 = vcombine.high %v2046_v40, %v3868_v45  ;;  %v2077_v60 = vshrl.u32 %v2053_v51, 16 }
 0x71f   : > { %v2074_v39 = vpack.i.b16 %v2053_v51, %v2019_v56  ;;  %v2055_v9 = vcombine.high %v2053_v51, %v3868_v45 }
 0x720   : > { %2088 = vxpose.xlu1.c.b16.start.end [1/1] (short) (narrow) %v2058_v44, 16  ;;  %v2062_v49 = vpack.i.b16 %v2061_v46, %v2060_v42  ;;  %v2069_v50 = vshrl.u32 %v2054_v47, 16  ;;  %v2066_v54 = vpack.i.b16 %v2054_v47, %v2020_v31  ;;  %v2078_v62 = vpack.i.b16 %v2077_v60, %v2076_v63 }
 0x721   : > { %v2085_v25 = vshrl.u32 %v2055_v9, 16  ;;  %v2082_v30 = vpack.i.b16 %v2055_v9, %v2021_v10 }
 0x722   : > { %2104 = vxpose.xlu0.c.b16.start.end [1/1] (short) (narrow) %v2062_v49, 16  ;;  %v2070_v59 = vpack.i.b16 %v2069_v50, %v2068_v55 }
 0x723   : > { %v2086_v29 = vpack.i.b16 %v2085_v25, %v2084_v12 }
 0x724   : > { %2120 = vxpose.xlu1.c.b16.start.end [1/1] (short) (narrow) %v2066_v54, 16 }
 0x726   : > { %2136 = vxpose.xlu0.c.b16.start.end [1/1] (short) (narrow) %v2070_v59, 16 }
 0x728   : > { %2152 = vxpose.xlu1.c.b16.start.end [1/1] (short) (narrow) %v2074_v39, 16 }
 0x72a   : > { %2168 = vxpose.xlu0.c.b16.start.end [1/1] (short) (narrow) %v2078_v62, 16 }
 0x735   : > { %1837 = vadd.xlane.f32.xlu1 %v1836_v3 }
 0x737   : > { %1840 = vadd.xlane.f32.xlu0 %v1839_v4 }
 0x739   : > { %1843 = vadd.xlane.f32.xlu1 %v1842_v7 }
 0x73b   : > { %1846 = vadd.xlane.f32.xlu0 %v1845_v8 }
 0x766   : > { %2184 = vxpose.xlu1.c.b16.start.end [1/1] (short) (narrow) %v2082_v30, 16 }
 0x768   : > { %2200 = vxpose.xlu0.c.b16.start.end [1/1] (short) (narrow) %v2086_v29, 16 }
 0x786   : > { %v2096_v13 = vpop.trf.xlu1 }
 0x788   : > { %v2112_v15 = vpop.trf.xlu0 }
 0x78a   : > { %v2128_v16 = vpop.trf.xlu1 }
 0x78c   : > { %v2144_v17 = vpop.trf.xlu0 }
 0x78e   : > { %v2160_v18 = vpop.trf.xlu1 }
 0x78f   : > { %v2216_v24 = vcombine.low %v2096_v13, %v2160_v18 }
 0x790   : > { %v2176_v19 = vpop.trf.xlu0 }
 0x791   : > { %v2241_v28 = vcombine.low %v2112_v15, %v2176_v19  ;;  %v2223_v37 = vrot.slane %v2216_v24, %v4338_v43 }
 0x793   : > { %v2248_v46 = vrot.slane %v2241_v28, %v4338_v43 }
 0x7c2   : > { %v1838_v20 = vpop.xlane.xlu1 %1837 }
 0x7c3   : > { %3620 = vrcp.f32 %v1838_v20 }
 0x7c4   : > { %v1841_v21 = vpop.xlane.xlu0 %1840 }
 0x7c5   : > { %3622 = vrcp.f32 %v1841_v21 }
 0x7c6   : > { %v1844_v22 = vpop.xlane.xlu1 %1843 }
 0x7c7   : > { %3624 = vrcp.f32 %v1844_v22 }
 0x7c8   : > { %v1847_v23 = vpop.xlane.xlu0 %1846 }
 0x7c9   : > { %3626 = vrcp.f32 %v1847_v23 }
 0x7cc   : > { %v2192_v26 = vpop.trf.xlu1 }
 0x7cd   : > { %v3621_v27 = vpop.eup %3620  ;;  %v2224_v32 = vcombine.low %v2128_v16, %v2192_v26 }
 0x7ce   : > { %v2208_v33 = vpop.trf.xlu0  ;;  %v1852_v34 = vmul.f32 %v3621_v27, %v3613_v2 }
 0x7cf   : > { %v3623_v36 = vpop.eup %3622  ;;  %v2231_v38 = vrot.slane %v2224_v32, %v4338_v43  ;;  %v2249_v40 = vcombine.low %v2144_v17, %v2208_v33 }
 0x7d0   : > { %v1856_v41 = vpack.c.bf16 %v1852_v34, %v1852_v34  ;;  %v1853_v42 = vmul.f32 %v3623_v36, %v3615_v35 }
 0x7d1   : > { %v3625_v44 = vpop.eup %3624  ;;  %v2232_v31 = vcombine.low %v2223_v37, %v2231_v38  ;;  %v2256_v47 = vrot.slane %v2249_v40, %v4338_v43 }
 0x7d2   : > { %v2282_v48 = vsel %vm1622_vm4, %v1856_v41, 0  ;;  %v1857_v49 = vpack.c.bf16 %v1853_v42, %v1853_v42  ;;  %v1854_v50 = vmul.f32 %v3625_v44, %v3617_v5  ;;  %v3602_v41 = vld [vmem:[%s4262_s29] sm:$0xff]  }
 0x7d3   : > { %v3627_v51 = vpop.eup %3626  ;;  %v2239_v53 = vrot.slane %v2232_v31, %v4343_v52  ;;  %v2257_v54 = vcombine.low %v2248_v46, %v2256_v47  ;;  %3418 = vmatpush3.bf16.xpose.msra.mxu0 %v2282_v48 }
 0x7d4   : > { %v2328_v55 = vsel %vm1622_vm4, %v1857_v49, 0  ;;  %3429 = vmatprep.subr.bf16.mxu0 %v3860_v11  ;;  %v1855_v56 = vmul.f32 %v3627_v51, %v3619_v6  ;;  %v1858_v58 = vpack.c.bf16 %v1854_v50, %v1854_v50  ;;  %v3603_v51 = vld [vmem:[%s4262_s29 + $0x8] sm:$0xff]   ;;  %s3870_s29 = smov 16  }
 0x7d5   : > { %v2264_v57 = vrot.slane %v2257_v54, %v4343_v52  ;;  %3424 = vmatpush3.bf16.xpose.msra.mxu1 %v2328_v55  ;;  %v2269_v59 = vshrl.u32 %v2239_v53, 16  ;;  %v2240_v62 = vcombine.high %v2239_v53, %v3868_v45 }
 0x7d6   : > { %3435 = vmatprep.subr.bf16.mxu1 %v3860_v11  ;;  %v1859_v14 = vpack.c.bf16 %v1855_v56, %v1855_v56  ;;  %v2374_v0 = vsel %vm1622_vm4, %v1858_v58, 0 }
 0x7d7   : > { %v2268_v60 = vpack.i.b16 %v2264_v57, %v2239_v53  ;;  %v2270_v61 = vshrl.u32 %v2264_v57, 16  ;;  %v2265_v63 = vcombine.high %v2264_v57, %v3868_v45  ;;  %v2275_v35 = vshrl.u32 %v2240_v62, 16 }
 0x7d8   : > { %v2420_v1 = vsel %vm1622_vm4, %v1859_v14, 0 }
 0x7d9   : > { %v2271_v39 = vpack.i.b16 %v2270_v61, %v2269_v59  ;;  %v2276_v2 = vshrl.u32 %v2265_v63, 16  ;;  %v2274_v3 = vpack.i.b16 %v2265_v63, %v2240_v62 }
 0x7da   : > { %3420 = vmatmul.mubr.msk.bf16.vlgmr.msra.gmra.mrb[4].mxu0 %vm1622_vm4, %v2268_v60 }
 0x7db   : > { %3430 = vmatpush3.bf16.xpose.msra.mxu0 %v2374_v0  ;;  %3431 = vmatprep.mubr.msk.bf16.mxu0 %vm3861_vm2, %v3860_v11  ;;  %v2277_v5 = vpack.i.b16 %v2276_v2, %v2275_v35 }
 0x7dc   : > { %3426 = vmatmul.mubr.msk.bf16.vlgmr.msra.gmra.mrb[16].mxu1 %vm1622_vm4, %v2271_v39  ;;  %3441 = vmatprep.subr.bf16.mxu0 %v3860_v11 }
 0x7dd   : > { %3436 = vmatpush3.bf16.xpose.msra.mxu1 %v2420_v1  ;;  %3437 = vmatprep.mubr.msk.bf16.mxu1 %vm3861_vm2, %v3860_v11 }
 0x7de   : > { %3449 = vmatprep.subr.bf16.mxu1 %v3860_v11 }
 0x7e2   : > { %3432 = vmatmul.mubr.msk.bf16.vlgmr.msra.gmra.mrb[8].mxu0 %vm1622_vm4, %v2274_v3 }
 0x7e3   : > { %3445 = vmatprep.mubr.msk.bf16.mxu0 %vm3861_vm2, %v3860_v11  ;;  %3442 = vmatpush3.bf16.msra.mxu0 %v3602_v41  ;;  %v3334_v41 = vld [vmem:[%s4761_s9] ss:$0 sm:$0xff] }
 0x7e4   : > { %3438 = vmatmul.mubr.msk.bf16.vlgmr.msra.gmra.mrb[20].mxu1 %vm1622_vm4, %v2277_v5  ;;  %3443 = vmatprep.subr.bf16.mxu0 %v3860_v11 }
 0x7e5   : > { %3453 = vmatprep.mubr.msk.bf16.mxu1 %vm3861_vm2, %v3860_v11 }
 0x7e7   : > { %3444 = vmatpush3.bf16.msra.mxu0 %v3603_v51 }
 0x7e8   : > { %3457 = vmatprep.subr.bf16.mxu0 %v3860_v11 }
 0x8ad   : > { %v2318_v45 = vpop.f32.mrb[4].mxu0 }
 0x8ae   : > { %2462 = vxpose.xlu1.b32.start.end [1/1] (short) (narrow) %v2318_v45, 8  ;;  %v3421_v4 = vpop.f32.mrb[5].mxu0 }
 0x8af   : > { %v2321_v6 = vpop.f32.mrb[6].mxu0  ;;  %v2364_v7 = vpop.f32.mrb[16].mxu1 }
 0x8b0   : > { %2494 = vxpose.xlu0.b32.start.end [1/1] (short) (narrow) %v2364_v7, 8  ;;  %v3422_v8 = vpop.f32.mrb[7].mxu0  ;;  %v3427_v9 = vpop.f32.mrb[17].mxu1  ;;  %v3328_v6 = vld [vmem:[%s4758_s21] ss:$0 sm:$0xff] }
 0x8b1   : > { %v2367_v10 = vpop.f32.mrb[18].mxu1 }
 0x8b2   : > { %v3428_v25 = vpop.f32.mrb[19].mxu1 }
 0x8b3   : > { %v3634_v25 = vld [vmem:[#allocation2] sm:$0xff] }
 0x8b5   : > { %v2410_v30 = vpop.f32.mrb[8].mxu0 }
 0x8b6   : > { %2526 = vxpose.xlu0.b32.start.end [1/1] (short) (narrow) %v2410_v30, 8  ;;  %v3433_v12 = vpop.f32.mrb[9].mxu0 }
 0x8b7   : > { %v2413_v29 = vpop.f32.mrb[10].mxu0  ;;  %v2456_v13 = vpop.f32.mrb[20].mxu1 }
 0x8b8   : > { %v3434_v15 = vpop.f32.mrb[11].mxu0  ;;  %v3439_v16 = vpop.f32.mrb[21].mxu1 }
 0x8b9   : > { %v2459_v17 = vpop.f32.mrb[22].mxu1 }
 0x8ba   : > { %v3440_v18 = vpop.f32.mrb[23].mxu1  ;;  %2558 = vxpose.xlu0.b32.start.end [1/1] (short) (narrow) %v2456_v13, 8 }
 0x92e   : > { %v2478_v21 = vpop.trf.xlu1 }
 0x930   : > { %v2510_v19 = vpop.trf.xlu0 }
 0x936   : > { %v2542_v20 = vpop.trf.xlu0 }
 0x937   : > { %v2590_v22 = vcombine.low %v2478_v21, %v2542_v20  ;;  %v2591_v23 = vcombine.high %v2478_v21, %v2542_v20  ;;  %v3605_v20 = vld [vmem:[%s4279_s0 + $0x8] sm:$0xff]  }
 0x939   : > { %v2598_v28 = vrot.slane %v2590_v22, %v4338_v43  ;;  %v2605_v32 = vrot.slane %v2591_v23, %v4338_v43 }
 0x93a   : > { %v2574_v24 = vpop.trf.xlu0 }
 0x93b   : > { %v2606_v26 = vcombine.low %v2510_v19, %v2574_v24  ;;  %v2607_v27 = vcombine.high %v2510_v19, %v2574_v24  ;;  %v3604_v19 = vld [vmem:[%s4279_s0] sm:$0xff]  }
 0x93c   : > { %3450 = vmatpush3.bf16.msra.mxu1 %v3604_v19 }
 0x93d   : > { %v2614_v33 = vrot.slane %v2606_v26, %v4338_v43  ;;  %v2621_v34 = vrot.slane %v2607_v27, %v4338_v43  ;;  %3451 = vmatprep.subr.bf16.mxu1 %v3860_v11  ;;  %v3332_v26 = vld [vmem:[%s754_s23] ss:$0 sm:$0xff] }
 0x93f   : > { %v2622_v36 = vcombine.low %v2598_v28, %v2614_v33  ;;  %v2623_v37 = vcombine.high %v2598_v28, %v2614_v33  ;;  %v2638_v38 = vcombine.low %v2605_v32, %v2621_v34  ;;  %v2639_v40 = vcombine.high %v2605_v32, %v2621_v34  ;;  %v3333_v28 = vld [vmem:[%s757_s22] ss:$0 sm:$0xff] }
 0x940   : > { %3452 = vmatpush3.bf16.msra.mxu1 %v3605_v20 }
 0x941   : > { %v2630_v42 = vrot.slane %v2622_v36, %v4343_v52  ;;  %v2637_v44 = vrot.slane %v2623_v37, %v4343_v52  ;;  %v2646_v46 = vrot.slane %v2638_v38, %v4343_v52  ;;  %v2653_v31 = vrot.slane %v2639_v40, %v4343_v52  ;;  %v3606_v36 = vld [vmem:[%s4289_s8] sm:$0xff]   ;;  %v3607_v37 = vld [vmem:[%s4289_s8 + $0x8] sm:$0xff]   ;;  %v3608_v38 = vld [vmem:[%s4289_s8 + $0x10] sm:$0xff]  }
 0x942   : > { %v3609_v40 = vld [vmem:[%s4289_s8 + $0x18] sm:$0xff]  }
 0x943   : > { %v2658_v47 = vcombine.low %v2630_v42, %v2637_v44  ;;  %v3326_v48 = vcombine.high %v2630_v42, %v2637_v44  ;;  %v2674_v49 = vcombine.low %v2646_v46, %v2653_v31  ;;  %v3327_v50 = vcombine.high %v2646_v46, %v2653_v31 }
 0x945   : > { %v2665_v53 = vrot.slane %v2658_v47, %v4338_v43  ;;  %v2673_v54 = vrot.slane %v3326_v48, %v4338_v43  ;;  %v2681_v55 = vrot.slane %v2674_v49, %v4338_v43  ;;  %v2689_v56 = vrot.slane %v3327_v50, %v4338_v43 }
 0x947   : > { %v2691_v57 = vcombine.high %v2665_v53, %v2673_v54  ;;  %v2707_v58 = vcombine.high %v2681_v55, %v2689_v56  ;;  %v2690_v59 = vcombine.low %v2665_v53, %v2673_v54  ;;  %v2706_v60 = vcombine.low %v2681_v55, %v2689_v56 }
 0x949   : > { %v2705_v61 = vrot.slane %v2691_v57, %v4343_v52  ;;  %v2721_v14 = vrot.slane %v2707_v58, %v4343_v52  ;;  %v2698_v39 = vrot.slane %v2690_v59, %v4343_v52  ;;  %v2714_v63 = vrot.slane %v2706_v60, %v4343_v52 }
 0x94b   : > { %v2724_v0 = vcombine.low %v2705_v61, %v2721_v14  ;;  %v2723_v62 = vcombine.high %v2698_v39, %v2714_v63  ;;  %v2722_v1 = vcombine.low %v2698_v39, %v2714_v63  ;;  %v2725_v43 = vcombine.high %v2705_v61, %v2721_v14 }
 0x94d   : > { %2731 = vrot.lane.b32.xlu0 %v2724_v0, %s3870_s29  ;;  %2727 = vrot.lane.b32.xlu1 %v2723_v62, %s3871_s4 }
 0x951   : > { %2735 = vrot.lane.b32.xlu1 %v2725_v43, %s3872_s12 }
 0x9bf   : > { %v2728_v2 = vpop.permute.xlu1 %2727  ;;  %v2732_v35 = vpop.permute.xlu0 %2731 }
 0x9c0   : > { %v2738_v3 = vsel %vm1622_vm4, %v2722_v1, %v2728_v2 }
 0x9c1   : > { %v2740_v45 = vsel %vm2739_vm5, %v2738_v3, %v2732_v35 }
 0x9c3   : > { %v2736_v5 = vpop.permute.xlu1 %2735 }
 0x9c4   : > { %v2742_v52 = vsel %vm2741_vm6, %v2740_v45, %v2736_v5 }
 0x9c5   : > { %v2743_v4 = vpack.c.bf16 %v2742_v52, %v2742_v52  ;;  %v3338_v52 = vld [vmem:[%s770_s18] ss:$0 sm:$0xff] }
 0x9c7   : > { %3446 = vmatmul.mubr.msk.bf16.vlgmr.msra.gmra.mrb[12].mxu0 %vm784_vm1, %v2743_v4 }
 0x9c8   : > { %3465 = vmatprep.mubr.msk.bf16.mxu0 %vm3861_vm2, %v3860_v11  ;;  %3458 = vmatpush3.bf16.msra.mxu0 %v3606_v36 }
 0x9c9   : > { %3459 = vmatprep.subr.bf16.mxu0 %v3860_v11 }
 0x9cc   : > { %3460 = vmatpush3.bf16.msra.mxu0 %v3607_v37 }
 0x9cd   : > { %3461 = vmatprep.subr.bf16.mxu0 %v3860_v11 }
 0x9d0   : > { %3462 = vmatpush3.bf16.msra.mxu0 %v3608_v38 }
 0x9d1   : > { %3463 = vmatprep.subr.bf16.mxu0 %v3860_v11 }
 0x9d4   : > { %3464 = vmatpush3.bf16.msra.mxu0 %v3609_v40 }
 0xa9a   : > { %v2804_v7 = vpop.f32.mrb[12].mxu0 }
 0xa9b   : > { %v2805_v8 = vadd.f32 %v3328_v6, %v2804_v7  ;;  %v3447_v9 = vpop.f32.mrb[13].mxu0 }
 0xa9c   : > { %v2807_v10 = vpop.f32.mrb[14].mxu0 }
 0xa9d   : > { %v4538_v30 = vadd.f32 %v3634_v25, %v2805_v8  ;;  %v3448_v12 = vpop.f32.mrb[15].mxu0 }
 0xa9f   : > { %v2813_v29 = vsel %vm784_vm1, %v4538_v30, 0.0 }
 0xaa0   : > { %2814 = vadd.xlane.f32.xlu1 %v2813_v29 }
 0xb2d   : > { %v2815_v13 = vpop.xlane.xlu1 %2814 }
 0xb2e   : > { %v2816_v15 = vmul.f32 0.03125, %v2815_v13 }
 0xb30   : > { %v2817_v16 = vsub.f32 %v4538_v30, %v2816_v15 }
 0xb32   : > { %v2818_v17 = vmul.f32 %v2817_v16, %v2817_v16 }
 0xb34   : > { %v2819_v18 = vsel %vm784_vm1, %v2818_v17, 0.0 }
 0xb35   : > { %2820 = vadd.xlane.f32.xlu0 %v2819_v18 }
 0xbc2   : > { %v2821_v21 = vpop.xlane.xlu0 %2820 }
 0xbc3   : > { %v2822_v22 = vmul.f32 0.03125, %v2821_v21  ;;  %v3345_v21 = vld [vmem:[%s4763_s28] ss:$0 sm:$0xff] (!%p3344_p10) }
 0xbc5   : > { %v2823_v23 = vadd.f32 1e-06, %v2822_v22 }
 0xbc7   : > { %3628 = vrsqrt.f32 %v2823_v23  ;;  %v3346_v23 = vld [vmem:[%s4764_s19] ss:$0 sm:$0xff] (!%p3344_p10) }
 0xbd1   : > { %v3629_v24 = vpop.eup %3628 }
 0xbd2   : > { %v2825_v27 = vmul.f32 %v3629_v24, %v2817_v16 }
 0xbd4   : > { %v2832_v32 = vmul.f32 %v3332_v26, %v2825_v27 }
 0xbd6   : > { %v2839_v33 = vadd.f32 %v3333_v28, %v2832_v32 }
 0xbd8   : > { %v2840_v34 = vpack.c.bf16 %v2839_v33, %v2839_v33 }
 0xbda   : > { %3454 = vmatmul.mubr.msk.bf16.vlgmr.msra.gmra.mrb[24].mxu1 %vm784_vm1, %v2840_v34 }
 0xcad   : > { %v2901_v42 = vpop.f32.mrb[24].mxu1 }
 0xcae   : > { %v2902_v44 = vadd.f32 %v3334_v41, %v2901_v42  ;;  %v3455_v46 = vpop.f32.mrb[25].mxu1 }
 0xcaf   : > { %v2904_v31 = vpop.f32.mrb[26].mxu1 }
 0xcb0   : > { %v2908_v47 = vmul.f32 0.70710677, %v2902_v44  ;;  %v3456_v48 = vpop.f32.mrb[27].mxu1  ;;  %v2907_v35 = vmul.f32 0.5, %v2902_v44 }
 0xcb2   : > { %v2909_v49 = vand.u32 2147483647, %v2908_v47  ;;  %vm2928_vm7 = vcmp.ge.f32.partialorder %v2908_v47, 0.0 }
 0xcb4   : > { %v2910_v50 = vmul.f32 0.3275911, %v2909_v49  ;;  %v2922_v53 = vsub.f32 0.0, %v2909_v49 }
 0xcb6   : > { %v2911_v51 = vadd.f32 1.0, %v2910_v50  ;;  %v2923_v55 = vmul.f32 %v2922_v53, %v2909_v49 }
 0xcb8   : > { %3630 = vrcp.f32 %v2911_v51  ;;  %v2924_v58 = vmul.f32 1.442695, %v2923_v55 }
 0xcba   : > { %3632 = vpow2.f32 %v2924_v58 }
 0xcc2   : > { %v3631_v54 = vpop.eup %3630 }
 0xcc3   : > { %v2913_v56 = vmul.f32 1.0614054, %v3631_v54 }
 0xcc4   : > { %v3633_v0 = vpop.eup %3632 }
 0xcc5   : > { %v2914_v57 = vadd.f32 -1.4531521, %v2913_v56 }
 0xcc7   : > { %v2915_v11 = vmul.f32 %v3631_v54, %v2914_v57 }
 0xcc9   : > { %v2916_v59 = vadd.f32 1.4214138, %v2915_v11 }
 0xccb   : > { %v2917_v60 = vmul.f32 %v3631_v54, %v2916_v59 }
 0xccd   : > { %v2918_v61 = vadd.f32 -0.28449672, %v2917_v60 }
 0xccf   : > { %v2919_v14 = vmul.f32 %v3631_v54, %v2918_v61 }
 0xcd1   : > { %v2920_v39 = vadd.f32 0.2548296, %v2919_v14 }
 0xcd3   : > { %v2921_v63 = vmul.f32 %v3631_v54, %v2920_v39 }
 0xcd5   : > { %v2926_v62 = vmul.f32 %v3633_v0, %v2921_v63 }
 0xcd7   : > { %v2927_v1 = vsub.f32 1.0, %v2926_v62 }
 0xcd9   : > { %v2929_v43 = vsub.f32 0.0, %v2927_v1 }
 0xcdb   : > { %v2930_v2 = vsel %vm2928_vm7, %v2927_v1, %v2929_v43 }
 0xcdc   : > { %v2931_v3 = vadd.f32 1.0, %v2930_v2 }
 0xcde   : > { %v2932_v5 = vmul.f32 %v2931_v3, %v2907_v35 }
 0xce0   : > { %v2933_v45 = vpack.c.bf16 %v2932_v5, %v2932_v5 }
 0xce2   : > { %3466 = vmatmul.mubr.msk.bf16.vlgmr.msra.gmra.mrb[16].mxu0 %vm2973_vm8, %v2933_v45 }
 0xdb4   : > { %3022 = sbr.rel (%p3344_p10) target bundleno = 3836 (0xefc), region = 104 }
 0xdb5   : > { %v3011_v4 = vpop.f32.mrb[16].mxu0 }
 0xdb6   : > { %v3012_v6 = vadd.f32 %v3338_v52, %v3011_v4  ;;  %v3467_v7 = vpop.f32.mrb[17].mxu0 }
 0xdb7   : > { %v3014_v8 = vpop.f32.mrb[18].mxu0 }
 0xdb8   : > { %v3017_v9 = vadd.f32 %v3012_v6, %v4538_v30  ;;  %v3468_v10 = vpop.f32.mrb[19].mxu0 }
 0xdba   : > { %3018 = vst.msk [vmem:[#allocation2] sm:$0xff] %vm784_vm1, %v3017_v9 }
 0xdc1   : > { %v3023_v25 = vld [vmem:[#allocation2] sm:$0xff] }
 0xdc2   : > { %v3026_v12 = vsel %vm784_vm1, %v3023_v25, 0.0 }
 0xdc3   : > { %3027 = vadd.xlane.f32.xlu0 %v3026_v12 }
 0xe50   : > { %v3028_v29 = vpop.xlane.xlu0 %3027 }
 0xe51   : > { %v3029_v13 = vmul.f32 0.03125, %v3028_v29 }
 0xe53   : > { %v3030_v15 = vsub.f32 %v3023_v25, %v3029_v13 }
 0xe55   : > { %v3031_v16 = vmul.f32 %v3030_v15, %v3030_v15 }
 0xe57   : > { %v3032_v17 = vsel %vm784_vm1, %v3031_v16, 0.0 }
 0xe58   : > { %3033 = vadd.xlane.f32.xlu0 %v3032_v17 }
 0xee5   : > { %v3034_v18 = vpop.xlane.xlu0 %3033 }
 0xee6   : > { %v3035_v30 = vmul.f32 0.03125, %v3034_v18 }
 0xee8   : > { %v3036_v19 = vadd.f32 1e-06, %v3035_v30 }
 0xeea   : > { %3635 = vrsqrt.f32 %v3036_v19 }
 0xef4   : > { %v3636_v20 = vpop.eup %3635 }
 0xef5   : > { %v3038_v22 = vmul.f32 %v3636_v20, %v3030_v15 }
 0xef7   : > { %v3045_v24 = vmul.f32 %v3345_v21, %v3038_v22 }
 0xef9   : > { %v3052_v26 = vadd.f32 %v3346_v23, %v3045_v24 }
 0xefb   : > { %3053 = vst.msk [vmem:[%s729_s17] sm:$0xff] %vm784_vm1, %v3052_v26 }
 0xefc PF: > { %s4765_s14 = sld [smem:[#allocation19_spill]]  ;;  %s4766_s16 = sld [smem:[#allocation17_spill]] }
 0xefd   : > { %s4767_s30 = sld [smem:[#allocation23_spill]]  ;;  %s4768_s26 = sld [smem:[#allocation43_spill]] }
 0xefe   : > { %s3068_s21 = sshll.u32 %s729_s17, 4  ;;  %s3873_s20 = smov [#allocation9]   ;;  %s3069_s21 = int_to_ptr.vmem [resolvable:$true] %s3068_s21 }
 0xeff   : > { %s3725_s1 = scalar_lea.vmem %s3069_s21, 128  ;;  %s3729_s6 = sshll.u32 %s3873_s20, 4  ;;  %s3730_s6 = int_to_ptr.vmem [resolvable:$false] %s3729_s6 }
 0xf00   : > { %p3726_p0 = scmp.ne.s32.totalorder %s3069_s21, %s3725_s1  ;;  %s3731_s0 = scalar_lea.vmem %s3730_s6, 256 }
 0xf01   : > { %p3732_p11 = scmp.lt.s32.totalorder %s3069_s21, %s3730_s6  ;;  %p3733_p2 = scmp.lt.s32.totalorder %s3731_s0, %s3725_s1 }
 0xf02   : > { %s3348_s29 = sshll.u32 %s4765_s14, 7  ;;  %s4770_s11 = sand.u32 1, %s4766_s16  }
 0xf03   : > { %s4769_s13 = smov %s4768_s26  ;;  %s4589_s25 = scalar_lea.hbm %s4768_s26, %s3348_s29 }
 0xf04   : > { %s3055_s15 = scalar_lea.sflag [#allocation5], %s4770_s11  ;;  %p4771_p1 = scmp.ne.s32.totalorder %s4767_s30, 0 }
 0xf05   : > { %p3734_p9 = por %p3733_p2, %p3732_p11 }
 0xf06   : > { %p3727_p8 = pnand %p3726_p0, %p4771_p1 }
 0xf08   : > { %p3728_p7 = pneg %p3727_p8 }
 0xf0a   : > { %p3735_p4 = pnand %p3734_p9, %p3728_p7 }
 0xf0c   : > { %3738 = shalt.err (!%p3735_p4)
}
 0xf0d   : > { %s3739_s7 = scalar_lea.hbm %s4589_s25, 128  ;;  %s3743_s22 = scalar_lea.hbm %s4769_s13, 256 }
 0xf0e   : > { %p3740_p6 = scmp.ne.s32.totalorder %s4589_s25, %s3739_s7  ;;  %p3744_p3 = scmp.lt.u32.totalorder %s4589_s25, %s4769_s13 }
 0xf0f   : > { %p3745_p5 = scmp.lt.u32.totalorder %s3743_s22, %s3739_s7  ;;  %p3747_p0 = scmp.lt.u32.totalorder %s3739_s7, %s4589_s25 }
 0xf10   : > { %p3741_p12 = pnand %p3740_p6, %p4771_p1 }
 0xf11   : > { %p3746_p10 = por %p3745_p5, %p3744_p3 }
 0xf12   : > { %p3742_p13 = pneg %p3741_p12 }
 0xf13   : > { %p3748_p8 = por %p3747_p0, %p3746_p10 }
 0xf15   : > { %p3749_p7 = pnand %p3748_p8, %p3742_p13 }
 0xf17   : > { %3752 = shalt.err (!%p3749_p7)
}
 0xf18   : > { %3477 = dma.vmem_to_hbm [thread:$0]  (%p4771_p1), %s3069_s21, 128, %s4589_s25, %s3055_s15  }
 0xf19 PF: > { %s4772_s18 = sld [smem:[#allocation22_spill]]  ;;  %s4773_s27 = sld [smem:[#allocation16_spill]] }
 0xf1a   : > { %s4774_s28 = sld [smem:[#allocation24_spill]] }
 0xf1f   : > { %p3497_p11 = scmp.ge.s32.totalorder %s4772_s18, 2  ;;  %s3080_s24 = sand.u32 1, %s4773_s27  }
 0xf20   : > { %p4775_p2 = scmp.ne.s32.totalorder %s4774_s28, 0  ;;  %s3081_s10 = scalar_lea.sflag [#allocation5], %s3080_s24 }
 0xf22   : > { %p3491_p9 = pnand %p3497_p11, %p4775_p2 }
 0xf24   : > { %3810 = dma.done.wait (!%p3491_p9), %s3081_s10, 128  }
 0xf25   : > { %3812 = vsyncadd (!%p3491_p9), %s3081_s10, 4294967168  ;;  %s33_s0 = sadd.s32 1, %s4772_s18   ;;  %s4776_s21 = sld [smem:[#allocation14_spill]] }
 0xf26   : > { %p30_p4 = scmp.ge.s32.totalorder %s33_s0, 6   ;;  %s4777_s22 = sld [smem:[#allocation15_spill]] }
 0xf27   : > { %s4778_s23 = sld [smem:[#allocation27_spill]]  ;;  %s4779_s24 = sld [smem:[#allocation17_spill]] }
 0xf28   : > { %s4780_s25 = sld [smem:[#allocation18_spill]]  ;;  %s4781_s26 = sld [smem:[#allocation28_spill]] }
 0xf29   : > { %s4782_s27 = sld [smem:[#allocation20_spill]]  ;;  %s4783_s28 = sld [smem:[#allocation21_spill]] }
 0xf2a   : > { %s4784_s29 = sld [smem:[#allocation25_spill]]  ;;  %s4785_s30 = sld [smem:[#allocation26_spill]] }
 0xf2b   :  { %32 = sbr.rel (!%p30_p4) target bundleno = 25 (0x19), region = 185 }
 0xf32   :  { %3086 = vsyncpa [#allocation4], 1 }
 0xf33   :  { %3088 = vsyncpa [#allocation4 + $0x1], 1 }
 0xf34   :  { %3089 = vsyncpa [#allocation7], 1 }
 0xf35   :  { %3090 = vsyncpa [#allocation5], 1 }
 0xf36   :  { %3092 = vsyncpa [#allocation5 + $0x1], 1 }

</bundles_post_ra>
